<compile_context>
chip_gen: v5e
topology: v5e:2x2
jax: 0.10.0
libtpu: 0.0.40
codegen_flags: <defaults>
</compile_context>

<pallas_src>
import math
import functools
import numpy as np
import jax
import jax.numpy as jnp
from jax.experimental import pallas as pl
from jax.experimental.pallas import tpu as pltpu


def _round_up(x, m):
    return ((x + m - 1) // m) * m


# ----------------------------------------------------------------------------
# Synthetic mesh (deterministic): regular GxG grid triangulation of [-1, 1]^2.
# ----------------------------------------------------------------------------
def build_mesh(G=5):
    xs = np.linspace(-1.0, 1.0, G).astype(np.float32)
    verts = np.array([[xs[j], xs[i]] for i in range(G) for j in range(G)],
                     dtype=np.float32)                               # [V, 2]
    faces = []
    for i in range(G - 1):
        for j in range(G - 1):
            v00 = i * G + j
            v01 = i * G + j + 1
            v10 = (i + 1) * G + j
            v11 = (i + 1) * G + j + 1
            faces.append((v00, v01, v11))   # CCW
            faces.append((v00, v11, v10))   # CCW
    faces = np.array(faces, dtype=np.int32)                          # [F, 3]
    und = set()
    for (a, b, c) in faces:
        for e in ((a, b), (b, c), (c, a)):
            und.add((min(e), max(e)))
    edges = []
    for (a, b) in sorted(und):
        edges.append((a, b))
        edges.append((b, a))
    edges = np.array(edges, dtype=np.int32).T                        # [2, E]
    # ordered CCW boundary cycle
    bound = []
    for j in range(G):
        bound.append(j)                       # bottom row
    for i in range(1, G):
        bound.append(i * G + (G - 1))         # right col
    for j in range(G - 2, -1, -1):
        bound.append((G - 1) * G + j)         # top row (reversed)
    for i in range(G - 2, 0, -1):
        bound.append(i * G)                   # left col (reversed)
    bound = np.array(bound, dtype=np.int32)
    bset = set(bound.tolist())
    interior = np.array([v for v in range(G * G) if v not in bset],
                        dtype=np.int32)
    return verts, edges, faces, bound, interior


# ----------------------------------------------------------------------------
# Kernel A: fused activation + angle normalize + cumsum (MXU matmul against a
#           host-constant triangular matrix) + square boundary map, all layers
#           at once (rows = L*B), boundary positions packed lane-dense.
# ----------------------------------------------------------------------------
def _prep_kernel(var_ref, inv_scale_ref, eps_ref, tri_ref, act_ref, bpos_ref,
                 *, n_edges, n_bound):
    a = var_ref[...] * inv_scale_ref[...]
    eps = eps_ref[...]
    act = 1.0 / (1.0 + jnp.exp(-a))                     # exact sigmoid
    act = act * (1.0 - 2.0 * eps) + eps
    act_ref[...] = act                                  # lane-dense full store

    ang = act[:, n_edges:n_edges + n_bound]             # [rb, nB]
    ang_n = ang / jnp.sum(ang, axis=1, keepdims=True)   # exact normalization
    # cumsum along the boundary via the precomputed upper-tri * 2*pi matrix
    angle = jnp.dot(ang_n, tri_ref[...], preferred_element_type=jnp.float32)

    pi = math.pi
    sa = jnp.sin(angle)
    ca = jnp.cos(angle)
    t = sa / ca          # tan      (never selected where ca == 0)
    inv_t = ca / sa      # 1 / tan  (never selected where sa == 0)
    m1 = (angle > 7.0 * pi / 4.0) | (angle <= pi / 4.0)
    m2 = (angle > pi / 4.0) & (angle <= 3.0 * pi / 4.0)
    m3 = (angle > 3.0 * pi / 4.0) & (angle <= 5.0 * pi / 4.0)
    bx = jnp.where(m1, 1.0, jnp.where(m2, inv_t, jnp.where(m3, -1.0, -inv_t)))
    by = jnp.where(m1, t, jnp.where(m2, 1.0, jnp.where(m3, -t, -1.0)))

    rb = bx.shape[0]
    pad = bpos_ref.shape[1] - 2 * n_bound
    pieces = [bx, by]
    if pad > 0:
        pieces.append(jnp.zeros((rb, pad), jnp.float32))
    bpos_ref[...] = jnp.concatenate(pieces, axis=1)     # one unmasked store


def prep_activations(var_all, inv_scale, eps_cols, tri2pi, n_edges, n_bound):
    LB, C = var_all.shape
    NBP = max(128, _round_up(2 * n_bound, 128))
    rb = 256 if (LB >= 256 and LB % 256 == 0) else LB    # row tile ("parallel")
    grid = (LB // rb,)
    kern = functools.partial(_prep_kernel, n_edges=n_edges, n_bound=n_bound)
    act, bpos = pl.pallas_call(
        kern,
        grid=grid,
        in_specs=[pl.BlockSpec((rb, C), lambda i: (i, 0)),
                  pl.BlockSpec((1, C), lambda i: (0, 0)),
                  pl.BlockSpec((1, C), lambda i: (0, 0)),
                  pl.BlockSpec(tri2pi.shape, lambda i: (0, 0))],
        out_specs=[pl.BlockSpec((rb, C), lambda i: (i, 0)),
                   pl.BlockSpec((rb, NBP), lambda i: (i, 0))],
        out_shape=(jax.ShapeDtypeStruct((LB, C), jnp.float32),
                   jax.ShapeDtypeStruct((LB, NBP), jnp.float32)),
        compiler_params=pltpu.CompilerParams(dimension_semantics=("parallel",)),
    )(var_all, inv_scale, eps_cols, tri2pi)
    return act, bpos


# ----------------------------------------------------------------------------
# Kernel B (fused per-layer pipeline, all layers in one pallas_call):
#   grid = (batch, point_tile, layer), semantics ("parallel","parallel",
#   "arbitrary"); the point state is a VMEM-resident accumulator across layers.
#
#   state layout  [8, tp]: rows 0=px 1=py 2..5=running 2x2 distortion
#                          6=1.0 (homogeneous), 7=0.0
#   coeff         [3*F_pad, 8]: half-plane coeffs c_px, c_py (cols 0,1) and
#                          constant term (col 6); cols 2..5,7 are zero so the
#                          distortion rows of the state are ignored by the dot.
#   new_meta [L, B, 16, F_pad]: rows 0..5 = deformed A,B,C coords,
#                          rows 6..9 = per-face Jacobian j00,j01,j10,j11.
# ----------------------------------------------------------------------------
def _tutte_layer_kernel(pts0_ref, coeff_ref, meta_n_ref, state_ref,
                        *, f_pad, n_faces):
    layer = pl.program_id(2)

    @pl.when(layer == 0)
    def _():
        state_ref[...] = pts0_ref[...]

    st = state_ref[...]                                       # [8, tp]
    tp = st.shape[1]

    # --- face search: half-plane values for every (face edge, point) --------
    s = jnp.dot(coeff_ref[...], st,
                preferred_element_type=jnp.float32)           # [3*F_pad, tp]
    d1 = s[0:f_pad, :]
    d2 = s[f_pad:2 * f_pad, :]
    d3 = s[2 * f_pad:3 * f_pad, :]
    eps = jnp.float32(1e-6)
    inside = (d1 >= -eps) & (d2 >= -eps) & (d3 >= -eps)       # [F_pad, tp]
    iota_f = jax.lax.broadcasted_iota(jnp.int32, (f_pad, tp), 0
                                      ).astype(jnp.float32)
    big = jnp.float32(1e9)
    fid = jnp.min(jnp.where(inside, iota_f, big), axis=0, keepdims=True)
    # outside-mesh points: reference indexes faces[-1] (find_simplex == -1)
    fid = jnp.minimum(fid, jnp.float32(n_faces - 1))
    onehot = (iota_f == fid).astype(jnp.float32)              # [F_pad, tp]

    # --- one-hot MXU gather of deformed coords + per-face Jacobian ----------
    g = jnp.dot(meta_n_ref[...], onehot,
                preferred_element_type=jnp.float32)           # [16, tp]

    # --- barycentric areas from the already-computed half-plane values ------
    # d1 = 2*area_C, d2 = 2*area_A, d3 = 2*area_B (the factor 2 cancels below)
    area_a = jnp.abs(jnp.sum(onehot * d2, axis=0, keepdims=True))   # [1, tp]
    area_b = jnp.abs(jnp.sum(onehot * d3, axis=0, keepdims=True))
    area_c = jnp.abs(jnp.sum(onehot * d1, axis=0, keepdims=True))
    inv_total = 1.0 / jnp.maximum(area_a + area_b + area_c,
                                  jnp.float32(1e-12))
    pred_x = (g[0:1, :] * area_a + g[2:3, :] * area_b + g[4:5, :] * area_c) * inv_total
    pred_y = (g[1:2, :] * area_a + g[3:4, :] * area_b + g[5:6, :] * area_c) * inv_total

    # --- chain the per-face Jacobian with the running distortion: T' = J @ T
    j00 = g[6:7, :]
    j01 = g[7:8, :]
    j10 = g[8:9, :]
    j11 = g[9:10, :]
    t00 = st[2:3, :]
    t01 = st[3:4, :]
    t10 = st[4:5, :]
    t11 = st[5:6, :]
    c00 = j00 * t00 + j01 * t10
    c01 = j00 * t01 + j01 * t11
    c10 = j10 * t00 + j11 * t10
    c11 = j10 * t01 + j11 * t11

    # single full-block store of the next state
    state_ref[...] = jnp.concatenate(
        [pred_x, pred_y, c00, c01, c10, c11, st[6:7, :], st[7:8, :]], axis=0)


def _pick_tp(n_pad, batch):
    # largest 128-multiple <= 512 dividing n_pad (bounds vreg + VMEM pressure)
    cands = [c for c in (512, 384, 256, 128) if c <= n_pad and n_pad % c == 0]
    tp = cands[0] if cands else n_pad
    # v7x: keep >= 2 "parallel" grid steps so both TensorCores are engaged
    if batch * (n_pad // tp) < 2:
        smaller = [c for c in cands if n_pad // c >= 2]
        if smaller:
            tp = smaller[0]
    return tp


def fused_tutte_layers(pts0, coeff, new_meta, tp, f_pad, n_faces):
    B, _, N_pad = pts0.shape
    Lr = new_meta.shape[0]
    T = N_pad // tp
    kern = functools.partial(_tutte_layer_kernel, f_pad=f_pad, n_faces=n_faces)
    # TODO(synk): for very large meshes (F_pad >~ 1-2K), tile the face axis as
    # an inner "arbitrary" grid dim with a running-min fid accumulator so the
    # [3*F_pad, tp] intermediates stay under v7x's 32 MiB scoped VMEM.
    return pl.pallas_call(
        kern,
        grid=(B, T, Lr),
        in_specs=[pl.BlockSpec((None, 8, tp), lambda b, t, l: (b, 0, t)),
                  pl.BlockSpec(coeff.shape, lambda b, t, l: (0, 0)),
                  pl.BlockSpec((None, None, 16, f_pad),
                               lambda b, t, l: (l, b, 0, 0))],
        out_specs=pl.BlockSpec((None, 8, tp), lambda b, t, l: (b, 0, t)),
        out_shape=jax.ShapeDtypeStruct((B, 8, N_pad), jnp.float32),
        compiler_params=pltpu.CompilerParams(
            dimension_semantics=("parallel", "parallel", "arbitrary")),
    )(pts0, coeff, new_meta)


# ----------------------------------------------------------------------------
# TutteHead forward (JAX glue around the Pallas kernels)
# ----------------------------------------------------------------------------
def tutte_head_forward(var_preds, consts, batch_size, num_points,
                       input_radius=0.8):
    B = batch_size
    N = num_points
    Lr = len(var_preds)
    V = consts["verts_np"].shape[0]
    n_edges = consts["edges_np"].shape[1]
    bound = consts["bound_np"]
    interior = consts["interior_np"]
    n_bound = bound.shape[0]
    n_faces = consts["faces_np"].shape[0]
    F_pad = consts["coeff"].shape[0] // 3

    # ---- kernel A: activations + boundary square map for all layers ---------
    var_all = jnp.concatenate(var_preds, axis=0)              # [L*B, C]
    act, bpos = prep_activations(var_all, consts["inv_scale"],
                                 consts["eps_cols"], consts["tri2pi"],
                                 n_edges, n_bound)
    W_all = act[:, :n_edges]                                  # [L*B, E]
    bound_pos = jnp.stack([bpos[:, :n_bound],
                           bpos[:, n_bound:2 * n_bound]], axis=-1)  # [LB,nB,2]

    # ---- batched Laplacian assembly + interior solve for all layers (glue) --
    src = consts["edges_np"][0]
    dst = consts["edges_np"][1]
    LB = Lr * B
    adj = jnp.zeros((LB, V, V), jnp.float32).at[:, src, dst].set(W_all)
    deg = jnp.sum(adj, axis=2)
    Lap = (-adj).at[:, jnp.arange(V), jnp.arange(V)].add(deg)
    L_II = Lap[:, interior][:, :, interior]                   # [LB, nI, nI]
    L_IB = Lap[:, interior][:, :, bound]                      # [LB, nI, nB]
    rhs = -jnp.einsum("bij,bjk->bik", L_IB, bound_pos)        # [LB, nI, 2]
    # TODO(synk): batched dense interior Tutte solve has no clean Pallas
    # equivalent; stays in jnp.linalg.solve.
    x_int = jnp.linalg.solve(L_II, rhs)
    new_vertices_all = jnp.zeros((LB, V, 2), jnp.float32)
    new_vertices_all = new_vertices_all.at[:, bound].set(bound_pos)
    new_vertices_all = new_vertices_all.at[:, interior].set(x_int)
    new_vertices_all = new_vertices_all.reshape(Lr, B, V, 2)

    # ---- tiny per-(layer, batch) deformed-face table + per-face Jacobian ----
    faces = consts["faces_jnp"]                               # [F, 3]
    tri_new = new_vertices_all[:, :, faces, :]                # [L, B, F, 3, 2]
    nA = tri_new[:, :, :, 0, :]
    nB = tri_new[:, :, :, 1, :]
    nC = tri_new[:, :, :, 2, :]
    N00 = nB[..., 0] - nA[..., 0]
    N01 = nC[..., 0] - nA[..., 0]
    N10 = nB[..., 1] - nA[..., 1]
    N11 = nC[..., 1] - nA[..., 1]
    mi = consts["minv"]                                       # [4, F]
    j00 = N00 * mi[0] + N01 * mi[2]
    j01 = N00 * mi[1] + N01 * mi[3]
    j10 = N10 * mi[0] + N11 * mi[2]
    j11 = N10 * mi[1] + N11 * mi[3]
    meta_rows = jnp.stack([nA[..., 0], nA[..., 1], nB[..., 0], nB[..., 1],
                           nC[..., 0], nC[..., 1], j00, j01, j10, j11],
                          axis=2)                             # [L, B, 10, F]
    new_meta = jnp.zeros((Lr, B, 16, F_pad), jnp.float32)
    new_meta = new_meta.at[:, :, :10, :n_faces].set(meta_rows)

    # ---- initial lane-dense point state ------------------------------------
    N_pad = _round_up(N, 128)
    tp = _pick_tp(N_pad, B)
    theta = 2.0 * math.pi * jnp.arange(N, dtype=jnp.float32) / N
    px0 = input_radius * jnp.cos(theta)
    py0 = input_radius * jnp.sin(theta)
    pts0 = jnp.zeros((B, 8, N_pad), jnp.float32)
    pts0 = pts0.at[:, 0, :N].set(px0).at[:, 1, :N].set(py0)
    pts0 = pts0.at[:, 2, :].set(1.0).at[:, 5, :].set(1.0)   # identity distortion
    pts0 = pts0.at[:, 6, :].set(1.0)                        # homogeneous 1

    # ---- fused face-search + gather + barycentric map + chaining, all layers
    state = fused_tutte_layers(pts0, consts["coeff"], new_meta, tp,
                               F_pad, n_faces)               # [B, 8, N_pad]

    # padded tail points (N..N_pad) carry garbage; they are sliced off here.
    pred_points = jnp.transpose(state[:, 0:2, :N], (0, 2, 1))        # [B, N, 2]
    total_distortion = jnp.transpose(state[:, 2:6, :N],
                                     (0, 2, 1)).reshape(B, N, 2, 2)
    new_vertices = new_vertices_all[Lr - 1]                           # [B, V, 2]
    return pred_points, new_vertices, total_distortion


# ----------------------------------------------------------------------------
# Constants (mesh + packed face tables + activation scales)
# ----------------------------------------------------------------------------
def make_consts(G=5, w_scale=100.0, angle_scale=100.0, eps=1e-4, eps_angle=1e-4):
    verts, edges, faces, bound, interior = build_mesh(G)
    n_edges = edges.shape[1]
    n_bound = bound.shape[0]
    C = n_edges + n_bound
    inv_scale = np.full((1, C), 1.0 / w_scale, np.float32)
    inv_scale[0, n_edges:] = 1.0 / angle_scale
    eps_cols = np.full((1, C), eps, np.float32)
    eps_cols[0, n_edges:] = eps_angle

    # 2*pi-scaled upper-triangular cumsum matrix (host constant for kernel A)
    tri2pi = (np.triu(np.ones((n_bound, n_bound), np.float32))
              * np.float32(2.0 * math.pi))

    F = faces.shape[0]
    F_pad = _round_up(F, 8)
    A = verts[faces[:, 0]]
    Bv = verts[faces[:, 1]]
    Cv = verts[faces[:, 2]]

    # Half-plane coefficients: d_k(p) = c_px*px + c_py*py + c_1, inside (CCW
    # winding) iff d1,d2,d3 >= -eps.  Columns match the kernel state layout
    # (cols 0,1 -> px,py; col 6 -> homogeneous 1; cols 2..5,7 are zero so the
    # running-distortion rows of the state are ignored by the matmul).
    coeff = np.zeros((3 * F_pad, 8), np.float32)
    # edge 1: (B - A) x (p - A)  = 2 * signed area_C
    coeff[0:F, 0] = -(Bv[:, 1] - A[:, 1])
    coeff[0:F, 1] = (Bv[:, 0] - A[:, 0])
    coeff[0:F, 6] = (Bv[:, 1] - A[:, 1]) * A[:, 0] - (Bv[:, 0] - A[:, 0]) * A[:, 1]
    # edge 2: (C - B) x (p - B)  = 2 * signed area_A
    coeff[F_pad:F_pad + F, 0] = -(Cv[:, 1] - Bv[:, 1])
    coeff[F_pad:F_pad + F, 1] = (Cv[:, 0] - Bv[:, 0])
    coeff[F_pad:F_pad + F, 6] = (Cv[:, 1] - Bv[:, 1]) * Bv[:, 0] - (Cv[:, 0] - Bv[:, 0]) * Bv[:, 1]
    # edge 3: (A - C) x (p - C)  = 2 * signed area_B
    coeff[2 * F_pad:2 * F_pad + F, 0] = -(A[:, 1] - Cv[:, 1])
    coeff[2 * F_pad:2 * F_pad + F, 1] = (A[:, 0] - Cv[:, 0])
    coeff[2 * F_pad:2 * F_pad + F, 6] = (A[:, 1] - Cv[:, 1]) * Cv[:, 0] - (A[:, 0] - Cv[:, 0]) * Cv[:, 1]
    # padded faces can never be "inside"
    for k in range(3):
        coeff[k * F_pad + F:(k + 1) * F_pad, 6] = -1.0

    # Per-face inverse of the original-triangle edge matrix (for the per-face
    # Jacobian), with a SIGN-PRESERVING determinant clamp.
    m00 = Bv[:, 0] - A[:, 0]
    m01 = Cv[:, 0] - A[:, 0]
    m10 = Bv[:, 1] - A[:, 1]
    m11 = Cv[:, 1] - A[:, 1]
    det = m00 * m11 - m01 * m10
    det_safe = np.where(det >= 0.0, np.maximum(det, 1e-12),
                        np.minimum(det, -1e-12))
    minv = np.stack([m11 / det_safe, -m01 / det_safe,
                     -m10 / det_safe, m00 / det_safe], axis=0).astype(np.float32)

    return dict(
        verts_np=verts, edges_np=edges, faces_np=faces,
        bound_np=bound, interior_np=interior,
        faces_jnp=jnp.asarray(faces),
        coeff=jnp.asarray(coeff),
        minv=jnp.asarray(minv),
        tri2pi=jnp.asarray(tri2pi),
        inv_scale=jnp.asarray(inv_scale), eps_cols=jnp.asarray(eps_cols),
        n_var=C,
    )


if __name__ == "__main__":
    # runtime_cfg: num_layers=2, num_points=8, rotate_angle=False, fix_bound=False
    # model_cfg defaults: USE_SIGMOID, ANGLE_SIGMOID, W_SCALE=ANGLE_SCALE=100, eps=1e-4
    batch_size = 2
    num_points = 8
    num_layers = 2

    consts = make_consts(G=5)
    n_var = consts["n_var"]          # n_edges (112) + n_bound (16) = 128

    key = jax.random.PRNGKey(0)
    keys = jax.random.split(key, num_layers)
    var_preds = [jax.random.normal(k, (batch_size, n_var), jnp.float32) * 50.0
                 for k in keys]

    fwd = jax.jit(lambda *vps: tutte_head_forward(list(vps), consts,
                                                  batch_size, num_points))
    pred_points, new_vertices, total_distortion = fwd(*var_preds)
    jax.block_until_ready((pred_points, new_vertices, total_distortion))

    assert pred_points.shape == (batch_size, num_points, 2)
    assert new_vertices.shape == (batch_size, consts["verts_np"].shape[0], 2)
    assert total_distortion.shape == (batch_size, num_points, 2, 2)
    assert bool(jnp.all(jnp.isfinite(pred_points)))
    assert bool(jnp.all(jnp.isfinite(new_vertices)))
    assert bool(jnp.all(jnp.isfinite(total_distortion)))
    print("KERNEL_OK")
</pallas_src>

<mosaic_0001>
module attributes {stable_mosaic.version = 11 : i64} {
  func.func @_prep_kernel(%arg0: i32, %arg1: memref<4x128xf32, #tpu.memory_space<vmem>>, %arg2: memref<1x128xf32, #tpu.memory_space<vmem>>, %arg3: memref<1x128xf32, #tpu.memory_space<vmem>>, %arg4: memref<16x16xf32, #tpu.memory_space<vmem>>, %arg5: memref<4x128xf32, #tpu.memory_space<vmem>>, %arg6: memref<4x128xf32, #tpu.memory_space<vmem>>) attributes {dimension_semantics = [#tpu.dimension_semantics<parallel>], iteration_bounds = array<i64: 1>, scalar_prefetch = 0 : i64, scratch_operands = 0 : i64, tpu.core_type = #tpu.core_type<tc>, window_params = [{transform_indices = @transform_0, window_bounds = array<i64: 4, 128>}, {pipeline_mode = #tpu.pipeline_mode<synchronous>, transform_indices = @transform_1, window_bounds = array<i64: 1, 128>}, {pipeline_mode = #tpu.pipeline_mode<synchronous>, transform_indices = @transform_2, window_bounds = array<i64: 1, 128>}, {pipeline_mode = #tpu.pipeline_mode<synchronous>, transform_indices = @transform_3, window_bounds = array<i64: 16, 16>}, {transform_indices = @transform_4, window_bounds = array<i64: 4, 128>}, {transform_indices = @transform_5, window_bounds = array<i64: 4, 128>}]} {
    %c0 = arith.constant 0 : index
    %c0_0 = arith.constant 0 : index
    %0 = vector.load %arg1[%c0, %c0_0] : memref<4x128xf32, #tpu.memory_space<vmem>>, vector<4x128xf32>
    %c0_1 = arith.constant 0 : index
    %c0_2 = arith.constant 0 : index
    %1 = vector.load %arg2[%c0_1, %c0_2] : memref<1x128xf32, #tpu.memory_space<vmem>>, vector<1x128xf32>
    %2 = vector.broadcast %1 : vector<1x128xf32> to vector<4x128xf32>
    %3 = arith.mulf %0, %2 : vector<4x128xf32>
    %c0_3 = arith.constant 0 : index
    %c0_4 = arith.constant 0 : index
    %4 = vector.load %arg3[%c0_3, %c0_4] : memref<1x128xf32, #tpu.memory_space<vmem>>, vector<1x128xf32>
    %cst = arith.constant 0.000000e+00 : f32
    %5 = vector.broadcast %cst : f32 to vector<4x128xf32>
    %6 = arith.subf %5, %3 : vector<4x128xf32>
    %7 = math.exp %6 : vector<4x128xf32>
    %cst_5 = arith.constant 1.000000e+00 : f32
    %8 = vector.broadcast %cst_5 : f32 to vector<4x128xf32>
    %9 = arith.addf %8, %7 : vector<4x128xf32>
    %cst_6 = arith.constant 1.000000e+00 : f32
    %10 = vector.broadcast %cst_6 : f32 to vector<4x128xf32>
    %11 = arith.divf %10, %9 : vector<4x128xf32>
    %cst_7 = arith.constant 2.000000e+00 : f32
    %12 = vector.broadcast %cst_7 : f32 to vector<1x128xf32>
    %13 = arith.mulf %12, %4 : vector<1x128xf32>
    %cst_8 = arith.constant 1.000000e+00 : f32
    %14 = vector.broadcast %cst_8 : f32 to vector<1x128xf32>
    %15 = arith.subf %14, %13 : vector<1x128xf32>
    %16 = vector.broadcast %15 : vector<1x128xf32> to vector<4x128xf32>
    %17 = arith.mulf %11, %16 : vector<4x128xf32>
    %18 = vector.broadcast %4 : vector<1x128xf32> to vector<4x128xf32>
    %19 = arith.addf %17, %18 : vector<4x128xf32>
    %c0_9 = arith.constant 0 : index
    %c0_10 = arith.constant 0 : index
    %20 = vector.load %arg5[%c0_9, %c0_10] : memref<4x128xf32, #tpu.memory_space<vmem>>, vector<4x128xf32>
    tpu.vector_store %arg5[%c0_9, %c0_10], %19 {strides = array<i32>} : memref<4x128xf32, #tpu.memory_space<vmem>>, vector<4x128xf32>,
    %21 = vector.extract_strided_slice %19 {offsets = [0, 112], sizes = [4, 16], strides = [1, 1]} : vector<4x128xf32> to vector<4x16xf32>
    %cst_11 = arith.constant dense<0.000000e+00> : vector<4xf32>
    %22 = vector.multi_reduction <add>, %21, %cst_11 [1] : vector<4x16xf32> to vector<4xf32>
    %23 = vector.shape_cast %22 : vector<4xf32> to vector<4x1xf32>
    %24 = vector.broadcast %23 : vector<4x1xf32> to vector<4x16xf32>
    %25 = arith.divf %21, %24 : vector<4x16xf32>
    %c0_12 = arith.constant 0 : index
    %c0_13 = arith.constant 0 : index
    %26 = vector.load %arg4[%c0_12, %c0_13] : memref<16x16xf32, #tpu.memory_space<vmem>>, vector<16x16xf32>
    %cst_14 = arith.constant dense<0.000000e+00> : vector<4x16xf32>
    %27 = tpu.matmul %25, %26, %cst_14 {dimension_numbers = #tpu.dot_dimension_numbers<[1], [0], [0], [1], [0, 0, 1, 1], [], []>} : vector<4x16xf32>, vector<16x16xf32>, vector<4x16xf32> -> vector<4x16xf32>
    %28 = math.sin %27 : vector<4x16xf32>
    %29 = math.cos %27 : vector<4x16xf32>
    %30 = arith.divf %28, %29 : vector<4x16xf32>
    %31 = arith.divf %29, %28 : vector<4x16xf32>
    %cst_15 = arith.constant 5.497787 : f32
    %32 = vector.broadcast %cst_15 : f32 to vector<4x16xf32>
    %33 = arith.cmpf ogt, %27, %32 : vector<4x16xf32>
    %cst_16 = arith.constant 0.785398185 : f32
    %34 = vector.broadcast %cst_16 : f32 to vector<4x16xf32>
    %35 = arith.cmpf ole, %27, %34 : vector<4x16xf32>
    %36 = arith.ori %33, %35 : vector<4x16xi1>
    %cst_17 = arith.constant 0.785398185 : f32
    %37 = vector.broadcast %cst_17 : f32 to vector<4x16xf32>
    %38 = arith.cmpf ogt, %27, %37 : vector<4x16xf32>
    %cst_18 = arith.constant 2.3561945 : f32
    %39 = vector.broadcast %cst_18 : f32 to vector<4x16xf32>
    %40 = arith.cmpf ole, %27, %39 : vector<4x16xf32>
    %41 = arith.andi %38, %40 : vector<4x16xi1>
    %cst_19 = arith.constant 2.3561945 : f32
    %42 = vector.broadcast %cst_19 : f32 to vector<4x16xf32>
    %43 = arith.cmpf ogt, %27, %42 : vector<4x16xf32>
    %cst_20 = arith.constant 3.92699075 : f32
    %44 = vector.broadcast %cst_20 : f32 to vector<4x16xf32>
    %45 = arith.cmpf ole, %27, %44 : vector<4x16xf32>
    %46 = arith.andi %43, %45 : vector<4x16xi1>
    %cst_21 = arith.constant 0.000000e+00 : f32
    %47 = vector.broadcast %cst_21 : f32 to vector<4x16xf32>
    %48 = arith.subf %47, %31 : vector<4x16xf32>
    %cst_22 = arith.constant -1.000000e+00 : f32
    %49 = vector.broadcast %cst_22 : f32 to vector<4x16xf32>
    %50 = arith.select %46, %49, %48 : vector<4x16xi1>, vector<4x16xf32>
    %51 = arith.select %41, %31, %50 : vector<4x16xi1>, vector<4x16xf32>
    %cst_23 = arith.constant 1.000000e+00 : f32
    %52 = vector.broadcast %cst_23 : f32 to vector<4x16xf32>
    %53 = arith.select %36, %52, %51 : vector<4x16xi1>, vector<4x16xf32>
    %cst_24 = arith.constant 0.000000e+00 : f32
    %54 = vector.broadcast %cst_24 : f32 to vector<4x16xf32>
    %55 = arith.subf %54, %30 : vector<4x16xf32>
    %cst_25 = arith.constant -1.000000e+00 : f32
    %56 = vector.broadcast %cst_25 : f32 to vector<4x16xf32>
    %57 = arith.select %46, %55, %56 : vector<4x16xi1>, vector<4x16xf32>
    %cst_26 = arith.constant 1.000000e+00 : f32
    %58 = vector.broadcast %cst_26 : f32 to vector<4x16xf32>
    %59 = arith.select %41, %58, %57 : vector<4x16xi1>, vector<4x16xf32>
    %60 = arith.select %36, %30, %59 : vector<4x16xi1>, vector<4x16xf32>
    %cst_27 = arith.constant 0.000000e+00 : f32
    %61 = vector.broadcast %cst_27 : f32 to vector<4x96xf32>
    %62 = tpu.concatenate %53, %60, %61 in 1 : vector<4x16xf32>, vector<4x16xf32>, vector<4x96xf32> -> vector<4x128xf32>
    %c0_28 = arith.constant 0 : index
    %c0_29 = arith.constant 0 : index
    %63 = vector.load %arg6[%c0_28, %c0_29] : memref<4x128xf32, #tpu.memory_space<vmem>>, vector<4x128xf32>
    tpu.vector_store %arg6[%c0_28, %c0_29], %62 {strides = array<i32>} : memref<4x128xf32, #tpu.memory_space<vmem>>, vector<4x128xf32>,
    return
  }
  func.func @transform_0(%arg0: i32) -> (i32, i32) {
    %c0_i32 = arith.constant 0 : i32
    %c0_i32_0 = arith.constant 0 : i32
    return %arg0, %c0_i32 : i32, i32
  }
  func.func @transform_1(%arg0: i32) -> (i32, i32) {
    %c0_i32 = arith.constant 0 : i32
    %c0_i32_0 = arith.constant 0 : i32
    %c0_i32_1 = arith.constant 0 : i32
    return %c0_i32, %c0_i32_0 : i32, i32
  }
  func.func @transform_2(%arg0: i32) -> (i32, i32) {
    %c0_i32 = arith.constant 0 : i32
    %c0_i32_0 = arith.constant 0 : i32
    %c0_i32_1 = arith.constant 0 : i32
    return %c0_i32, %c0_i32_0 : i32, i32
  }
  func.func @transform_3(%arg0: i32) -> (i32, i32) {
    %c0_i32 = arith.constant 0 : i32
    %c0_i32_0 = arith.constant 0 : i32
    %c0_i32_1 = arith.constant 0 : i32
    return %c0_i32, %c0_i32_0 : i32, i32
  }
  func.func @transform_4(%arg0: i32) -> (i32, i32) {
    %c0_i32 = arith.constant 0 : i32
    %c0_i32_0 = arith.constant 0 : i32
    return %arg0, %c0_i32 : i32, i32
  }
  func.func @transform_5(%arg0: i32) -> (i32, i32) {
    %c0_i32 = arith.constant 0 : i32
    %c0_i32_0 = arith.constant 0 : i32
    return %arg0, %c0_i32 : i32, i32
  }
}

module attributes {stable_mosaic.version = 11 : i64} {
  func.func @_tutte_layer_kernel(%arg0: i32, %arg1: i32, %arg2: i32, %arg3: memref<1x8x128xf32, #tpu.memory_space<vmem>>, %arg4: memref<96x8xf32, #tpu.memory_space<vmem>>, %arg5: memref<1x1x16x32xf32, #tpu.memory_space<vmem>>, %arg6: memref<1x8x128xf32, #tpu.memory_space<vmem>>) attributes {dimension_semantics = [#tpu.dimension_semantics<parallel>, #tpu.dimension_semantics<parallel>, #tpu.dimension_semantics<arbitrary>], iteration_bounds = array<i64: 2, 1, 2>, scalar_prefetch = 0 : i64, scratch_operands = 0 : i64, tpu.core_type = #tpu.core_type<tc>, window_params = [{transform_indices = @transform_0, window_bounds = array<i64: 1, 8, 128>}, {pipeline_mode = #tpu.pipeline_mode<synchronous>, transform_indices = @transform_1, window_bounds = array<i64: 96, 8>}, {transform_indices = @transform_2, window_bounds = array<i64: 1, 1, 16, 32>}, {transform_indices = @transform_3, window_bounds = array<i64: 1, 8, 128>}]} {
    %c0_i32 = arith.constant 0 : i32
    %0 = arith.cmpi eq, %arg2, %c0_i32 : i32
    %1 = arith.extui %0 : i1 to i32
    %c0_i32_0 = arith.constant 0 : i32
    %2 = arith.cmpi ne, %1, %c0_i32_0 : i32
    scf.if %2 {
      %c0_27 = arith.constant 0 : index
      %c0_28 = arith.constant 0 : index
      %c0_29 = arith.constant 0 : index
      %98 = vector.load %arg3[%c0_27, %c0_28, %c0_29] : memref<1x8x128xf32, #tpu.memory_space<vmem>>, vector<1x8x128xf32>
      %99 = vector.shape_cast %98 : vector<1x8x128xf32> to vector<8x128xf32>
      %c0_30 = arith.constant 0 : index
      %c0_31 = arith.constant 0 : index
      %c0_32 = arith.constant 0 : index
      %100 = vector.load %arg6[%c0_30, %c0_31, %c0_32] : memref<1x8x128xf32, #tpu.memory_space<vmem>>, vector<1x8x128xf32>
      %101 = vector.shape_cast %100 : vector<1x8x128xf32> to vector<8x128xf32>
      %102 = vector.shape_cast %99 : vector<8x128xf32> to vector<1x8x128xf32>
      tpu.vector_store %arg6[%c0_30, %c0_31, %c0_32], %102 {strides = array<i32>} : memref<1x8x128xf32, #tpu.memory_space<vmem>>, vector<1x8x128xf32>,
    } else {
    }
    %c0 = arith.constant 0 : index
    %c0_1 = arith.constant 0 : index
    %c0_2 = arith.constant 0 : index
    %3 = vector.load %arg6[%c0, %c0_1, %c0_2] : memref<1x8x128xf32, #tpu.memory_space<vmem>>, vector<1x8x128xf32>
    %4 = vector.shape_cast %3 : vector<1x8x128xf32> to vector<8x128xf32>
    %c0_3 = arith.constant 0 : index
    %c0_4 = arith.constant 0 : index
    %5 = vector.load %arg4[%c0_3, %c0_4] : memref<96x8xf32, #tpu.memory_space<vmem>>, vector<96x8xf32>
    %cst = arith.constant dense<0.000000e+00> : vector<96x128xf32>
    %6 = tpu.matmul %5, %4, %cst {dimension_numbers = #tpu.dot_dimension_numbers<[1], [0], [0], [1], [0, 0, 1, 1], [], []>} : vector<96x8xf32>, vector<8x128xf32>, vector<96x128xf32> -> vector<96x128xf32>
    %7 = vector.extract_strided_slice %6 {offsets = [0, 0], sizes = [32, 128], strides = [1, 1]} : vector<96x128xf32> to vector<32x128xf32>
    %8 = vector.extract_strided_slice %6 {offsets = [32, 0], sizes = [32, 128], strides = [1, 1]} : vector<96x128xf32> to vector<32x128xf32>
    %9 = vector.extract_strided_slice %6 {offsets = [64, 0], sizes = [32, 128], strides = [1, 1]} : vector<96x128xf32> to vector<32x128xf32>
    %cst_5 = arith.constant 0.000000e+00 : f32
    %cst_6 = arith.constant 9.99999997E-7 : f32
    %10 = arith.subf %cst_5, %cst_6 : f32
    %11 = vector.broadcast %10 : f32 to vector<32x128xf32>
    %12 = arith.cmpf oge, %7, %11 : vector<32x128xf32>
    %cst_7 = arith.constant 0.000000e+00 : f32
    %cst_8 = arith.constant 9.99999997E-7 : f32
    %13 = arith.subf %cst_7, %cst_8 : f32
    %14 = vector.broadcast %13 : f32 to vector<32x128xf32>
    %15 = arith.cmpf oge, %8, %14 : vector<32x128xf32>
    %16 = arith.andi %12, %15 : vector<32x128xi1>
    %cst_9 = arith.constant 0.000000e+00 : f32
    %cst_10 = arith.constant 9.99999997E-7 : f32
    %17 = arith.subf %cst_9, %cst_10 : f32
    %18 = vector.broadcast %17 : f32 to vector<32x128xf32>
    %19 = arith.cmpf oge, %9, %18 : vector<32x128xf32>
    %20 = arith.andi %16, %19 : vector<32x128xi1>
    %21 = tpu.iota {dimensions = array<i32: 0>} : vector<32x128xi32>
    %22 = arith.sitofp %21 : vector<32x128xi32> to vector<32x128xf32>
    %cst_11 = arith.constant 1.000000e+09 : f32
    %23 = vector.broadcast %cst_11 : f32 to vector<32x128xf32>
    %24 = arith.select %20, %22, %23 : vector<32x128xi1>, vector<32x128xf32>
    %cst_12 = arith.constant dense<0x7F800000> : vector<128xf32>
    %25 = vector.multi_reduction <minimumf>, %24, %cst_12 [0] : vector<32x128xf32> to vector<128xf32>
    %26 = vector.shape_cast %25 : vector<128xf32> to vector<1x128xf32>
    %cst_13 = arith.constant 3.100000e+01 : f32
    %27 = vector.broadcast %cst_13 : f32 to vector<1x128xf32>
    %28 = arith.minimumf %26, %27 : vector<1x128xf32>
    %29 = vector.broadcast %28 : vector<1x128xf32> to vector<32x128xf32>
    %30 = arith.cmpf oeq, %22, %29 : vector<32x128xf32>
    %31 = arith.extui %30 : vector<32x128xi1> to vector<32x128xi32>
    %32 = arith.sitofp %31 : vector<32x128xi32> to vector<32x128xf32>
    %c0_14 = arith.constant 0 : index
    %c0_15 = arith.constant 0 : index
    %c0_16 = arith.constant 0 : index
    %c0_17 = arith.constant 0 : index
    %33 = vector.load %arg5[%c0_14, %c0_15, %c0_16, %c0_17] : memref<1x1x16x32xf32, #tpu.memory_space<vmem>>, vector<1x1x16x32xf32>
    %34 = vector.shape_cast %33 : vector<1x1x16x32xf32> to vector<16x32xf32>
    %cst_18 = arith.constant dense<0.000000e+00> : vector<16x128xf32>
    %35 = tpu.matmul %34, %32, %cst_18 {dimension_numbers = #tpu.dot_dimension_numbers<[1], [0], [0], [1], [0, 0, 1, 1], [], []>} : vector<16x32xf32>, vector<32x128xf32>, vector<16x128xf32> -> vector<16x128xf32>
    %36 = arith.mulf %32, %8 : vector<32x128xf32>
    %cst_19 = arith.constant dense<0.000000e+00> : vector<128xf32>
    %37 = vector.multi_reduction <add>, %36, %cst_19 [0] : vector<32x128xf32> to vector<128xf32>
    %38 = vector.shape_cast %37 : vector<128xf32> to vector<1x128xf32>
    %39 = math.absf %38 : vector<1x128xf32>
    %40 = arith.mulf %32, %9 : vector<32x128xf32>
    %cst_20 = arith.constant dense<0.000000e+00> : vector<128xf32>
    %41 = vector.multi_reduction <add>, %40, %cst_20 [0] : vector<32x128xf32> to vector<128xf32>
    %42 = vector.shape_cast %41 : vector<128xf32> to vector<1x128xf32>
    %43 = math.absf %42 : vector<1x128xf32>
    %44 = arith.mulf %32, %7 : vector<32x128xf32>
    %cst_21 = arith.constant dense<0.000000e+00> : vector<128xf32>
    %45 = vector.multi_reduction <add>, %44, %cst_21 [0] : vector<32x128xf32> to vector<128xf32>
    %46 = vector.shape_cast %45 : vector<128xf32> to vector<1x128xf32>
    %47 = math.absf %46 : vector<1x128xf32>
    %48 = arith.addf %39, %43 : vector<1x128xf32>
    %49 = arith.addf %48, %47 : vector<1x128xf32>
    %cst_22 = arith.constant 9.99999996E-13 : f32
    %50 = vector.broadcast %cst_22 : f32 to vector<1x128xf32>
    %51 = arith.maximumf %49, %50 : vector<1x128xf32>
    %cst_23 = arith.constant 1.000000e+00 : f32
    %52 = vector.broadcast %cst_23 : f32 to vector<1x128xf32>
    %53 = arith.divf %52, %51 : vector<1x128xf32>
    %54 = vector.extract_strided_slice %35 {offsets = [0, 0], sizes = [1, 128], strides = [1, 1]} : vector<16x128xf32> to vector<1x128xf32>
    %55 = arith.mulf %54, %39 : vector<1x128xf32>
    %56 = vector.extract_strided_slice %35 {offsets = [2, 0], sizes = [1, 128], strides = [1, 1]} : vector<16x128xf32> to vector<1x128xf32>
    %57 = arith.mulf %56, %43 : vector<1x128xf32>
    %58 = arith.addf %55, %57 : vector<1x128xf32>
    %59 = vector.extract_strided_slice %35 {offsets = [4, 0], sizes = [1, 128], strides = [1, 1]} : vector<16x128xf32> to vector<1x128xf32>
    %60 = arith.mulf %59, %47 : vector<1x128xf32>
    %61 = arith.addf %58, %60 : vector<1x128xf32>
    %62 = arith.mulf %61, %53 : vector<1x128xf32>
    %63 = vector.extract_strided_slice %35 {offsets = [1, 0], sizes = [1, 128], strides = [1, 1]} : vector<16x128xf32> to vector<1x128xf32>
    %64 = arith.mulf %63, %39 : vector<1x128xf32>
    %65 = vector.extract_strided_slice %35 {offsets = [3, 0], sizes = [1, 128], strides = [1, 1]} : vector<16x128xf32> to vector<1x128xf32>
    %66 = arith.mulf %65, %43 : vector<1x128xf32>
    %67 = arith.addf %64, %66 : vector<1x128xf32>
    %68 = vector.extract_strided_slice %35 {offsets = [5, 0], sizes = [1, 128], strides = [1, 1]} : vector<16x128xf32> to vector<1x128xf32>
    %69 = arith.mulf %68, %47 : vector<1x128xf32>
    %70 = arith.addf %67, %69 : vector<1x128xf32>
    %71 = arith.mulf %70, %53 : vector<1x128xf32>
    %72 = vector.extract_strided_slice %35 {offsets = [6, 0], sizes = [1, 128], strides = [1, 1]} : vector<16x128xf32> to vector<1x128xf32>
    %73 = vector.extract_strided_slice %35 {offsets = [7, 0], sizes = [1, 128], strides = [1, 1]} : vector<16x128xf32> to vector<1x128xf32>
    %74 = vector.extract_strided_slice %35 {offsets = [8, 0], sizes = [1, 128], strides = [1, 1]} : vector<16x128xf32> to vector<1x128xf32>
    %75 = vector.extract_strided_slice %35 {offsets = [9, 0], sizes = [1, 128], strides = [1, 1]} : vector<16x128xf32> to vector<1x128xf32>
    %76 = vector.extract_strided_slice %4 {offsets = [2, 0], sizes = [1, 128], strides = [1, 1]} : vector<8x128xf32> to vector<1x128xf32>
    %77 = vector.extract_strided_slice %4 {offsets = [3, 0], sizes = [1, 128], strides = [1, 1]} : vector<8x128xf32> to vector<1x128xf32>
    %78 = vector.extract_strided_slice %4 {offsets = [4, 0], sizes = [1, 128], strides = [1, 1]} : vector<8x128xf32> to vector<1x128xf32>
    %79 = vector.extract_strided_slice %4 {offsets = [5, 0], sizes = [1, 128], strides = [1, 1]} : vector<8x128xf32> to vector<1x128xf32>
    %80 = arith.mulf %72, %76 : vector<1x128xf32>
    %81 = arith.mulf %73, %78 : vector<1x128xf32>
    %82 = arith.addf %80, %81 : vector<1x128xf32>
    %83 = arith.mulf %72, %77 : vector<1x128xf32>
    %84 = arith.mulf %73, %79 : vector<1x128xf32>
    %85 = arith.addf %83, %84 : vector<1x128xf32>
    %86 = arith.mulf %74, %76 : vector<1x128xf32>
    %87 = arith.mulf %75, %78 : vector<1x128xf32>
    %88 = arith.addf %86, %87 : vector<1x128xf32>
    %89 = arith.mulf %74, %77 : vector<1x128xf32>
    %90 = arith.mulf %75, %79 : vector<1x128xf32>
    %91 = arith.addf %89, %90 : vector<1x128xf32>
    %92 = vector.extract_strided_slice %4 {offsets = [6, 0], sizes = [1, 128], strides = [1, 1]} : vector<8x128xf32> to vector<1x128xf32>
    %93 = vector.extract_strided_slice %4 {offsets = [7, 0], sizes = [1, 128], strides = [1, 1]} : vector<8x128xf32> to vector<1x128xf32>
    %94 = tpu.concatenate %62, %71, %82, %85, %88, %91, %92, %93 in 0 : vector<1x128xf32>, vector<1x128xf32>, vector<1x128xf32>, vector<1x128xf32>, vector<1x128xf32>, vector<1x128xf32>, vector<1x128xf32>, vector<1x128xf32> -> vector<8x128xf32>
    %c0_24 = arith.constant 0 : index
    %c0_25 = arith.constant 0 : index
    %c0_26 = arith.constant 0 : index
    %95 = vector.load %arg6[%c0_24, %c0_25, %c0_26] : memref<1x8x128xf32, #tpu.memory_space<vmem>>, vector<1x8x128xf32>
    %96 = vector.shape_cast %95 : vector<1x8x128xf32> to vector<8x128xf32>
    %97 = vector.shape_cast %94 : vector<8x128xf32> to vector<1x8x128xf32>
    tpu.vector_store %arg6[%c0_24, %c0_25, %c0_26], %97 {strides = array<i32>} : memref<1x8x128xf32, #tpu.memory_space<vmem>>, vector<1x8x128xf32>,
    return
  }
  func.func @transform_0(%arg0: i32, %arg1: i32, %arg2: i32) -> (i32, i32, i32) {
    %c0_i32 = arith.constant 0 : i32
    %c0_i32_0 = arith.constant 0 : i32
    return %arg0, %c0_i32, %arg1 : i32, i32, i32
  }
  func.func @transform_1(%arg0: i32, %arg1: i32, %arg2: i32) -> (i32, i32) {
    %c0_i32 = arith.constant 0 : i32
    %c0_i32_0 = arith.constant 0 : i32
    %c0_i32_1 = arith.constant 0 : i32
    return %c0_i32, %c0_i32_0 : i32, i32
  }
  func.func @transform_2(%arg0: i32, %arg1: i32, %arg2: i32) -> (i32, i32, i32, i32) {
    %c0_i32 = arith.constant 0 : i32
    %c0_i32_0 = arith.constant 0 : i32
    %c0_i32_1 = arith.constant 0 : i32
    return %arg2, %arg0, %c0_i32, %c0_i32_0 : i32, i32, i32, i32
  }
  func.func @transform_3(%arg0: i32, %arg1: i32, %arg2: i32) -> (i32, i32, i32) {
    %c0_i32 = arith.constant 0 : i32
    %c0_i32_0 = arith.constant 0 : i32
    return %arg0, %c0_i32, %arg1 : i32, i32, i32
  }
}

</mosaic_0001>

<bundles_post_ra>
// kernel: _lambda_.2
= control target key start
LH: loop header
LB: loop body
LE: loop exit
PB: predicated region body
PF: predicated region fallthrough
CT: control target
= control target key end

     0   :  { %s506_s24 = smov 16   ;;  %vm60_vm4 = vcmask 125952   ;;  %vm84_vm9 = vcmask 130048   ;;  %v507_v53 = vmov 683565275   ;;  %s635_s0 = inlined_call_operand.vmem [shape: f32[4,128], index: 0, kind: input, shape index: {}]   ;;  %s636_s1 = inlined_call_operand.vmem [shape: f32[1,128], index: 1, kind: input, shape index: {}]   ;;  %s637_s2 = inlined_call_operand.vmem [shape: f32[1,128], index: 2, kind: input, shape index: {}]   ;;  %s638_s4 = inlined_call_operand.vmem [shape: f32[4,128], index: 4, kind: output, shape index: {0}]   ;;  %s639_s3 = inlined_call_operand.vmem [shape: f32[16,16], index: 3, kind: input, shape index: {}]   ;;  %s640_s5 = inlined_call_operand.vmem [shape: f32[4,128], index: 5, kind: output, shape index: {1}]  }
   0x1   :  { %v19_v0 = vld [vmem:[%s635_s0] sm:$0xf]  ;;  %v80_v26 = vld [vmem:[%s639_s3 + $0x8] sm:$0xff]  ;;  %v508_v55 = vmov 2475754826  }
   0x2   :  { %v494_v1 = vld [vmem:[%s636_s1] ss:$0 sm:$0xff]  ;;  %101 = vmatpush.msra.mxu0 %v80_v26  ;;  %v509_v58 = vmov 2131351028   ;;  %v510_v61 = vmov 2102212464  }
   0x3   :  { %v24_v2 = vmul.f32 %v494_v1, %v19_v0  ;;  %v25_v7 = vld [vmem:[%s637_s2] sm:$0x1]  ;;  %v511_v0 = vmov 920167782  }
   0x4   :  { %v45_v8 = vmul.f32 2.0, %v25_v7  ;;  %v495_v20 = vld [vmem:[%s637_s2] ss:$0 sm:$0xff] }
   0x5   :  { %v26_v3 = vsub.f32 0.0, %v24_v2  ;;  %v79_v27 = vld [vmem:[%s639_s3] sm:$0xff] }
   0x6   :  { %v46_v12 = vsub.f32 1.0, %v45_v8  ;;  %102 = vmatpush.msra.mxu0 %v79_v27 }
   0x7   :  { %v27_v4 = vmul.f32 1.442695, %v26_v3  ;;  %v512_v3 = vmov 1326507024  }
   0x8   :  { %v48_v18 = vperm.slane %v46_v12, 0 }
   0x9   :  { %496 = vpow2.f32 %v27_v4 }
   0xf   :  { %v497_v5 = vpop.eup %496 }
  0x10   :  { %v29_v6 = vadd.f32 1.0, %v497_v5 }
  0x12   :  { %498 = vrcp.f32 %v29_v6  ;;  %v41_v11 = vand.u32 2147483648, %v29_v6  ;;  %vm35_vm0 = vweird.f32 %v29_v6  ;;  %v39_v14 = vand.u32 2147483647, %v29_v6 }
  0x14   :  { %v42_v16 = vor.u32 1.1754944e-38, %v41_v11  ;;  %vm40_vm3 = vcmp.eq.f32.partialorder %v39_v14, 8.507059e+37 }
  0x18   :  { %v499_v9 = vpop.eup %498 }
  0x19   :  { %v31_v10 = vmul.f32 %v499_v9, %v29_v6  ;;  %vm36_vm1 = vweird.f32 %v499_v9 }
  0x1a   :  { %vm37_vm2 = vmor %vm35_vm0, %vm36_vm1 }
  0x1b   :  { %v32_v13 = vsub.f32 1.0, %v31_v10 }
  0x1d   :  { %v33_v15 = vmul.f32 %v499_v9, %v32_v13 }
  0x1f   :  { %v34_v17 = vadd.f32 %v499_v9, %v33_v15 }
  0x21   :  { %v38_v19 = vsel %vm37_vm2, %v499_v9, %v34_v17 }
  0x22   :  { %v43_v21 = vsel %vm40_vm3, %v42_v16, %v38_v19 }
  0x23   :  { %v50_v22 = vmul.f32 %v48_v18, %v43_v21 }
  0x25   :  { %v54_v23 = vadd.f32 %v495_v20, %v50_v22 }
  0x27   :  { %57 = vrot.lane.b32.xlu0 %v54_v23, %s506_s24  ;;  %55 = vst [vmem:[%s638_s4] sm:$0xf] %v54_v23 }
  0x99   :  { %v58_v24 = vpop.permute.xlu0 %57 }
  0x9a   :  { %v61_v25 = vsel %vm60_vm4, %v58_v24, 0.0 }
  0x9b   :  { %62 = vadd.xlane.f32.xlu0 %v61_v25 }
 0x10e   :  { %v63_v28 = vpop.xlane.xlu0 %62 }
 0x10f   :  { %500 = vrcp.f32 %v63_v28  ;;  %v75_v32 = vand.u32 2147483648, %v63_v28  ;;  %v73_v34 = vand.u32 2147483647, %v63_v28  ;;  %vm69_vm6 = vweird.f32 %v63_v28 }
 0x111   :  { %v76_v36 = vor.u32 1.1754944e-38, %v75_v32  ;;  %vm74_vm8 = vcmp.eq.f32.partialorder %v73_v34, 8.507059e+37 }
 0x115   :  { %v501_v29 = vpop.eup %500 }
 0x116   :  { %v65_v30 = vmul.f32 %v501_v29, %v63_v28  ;;  %vm70_vm5 = vweird.f32 %v501_v29 }
 0x117   :  { %vm71_vm7 = vmor %vm69_vm6, %vm70_vm5 }
 0x118   :  { %v66_v31 = vsub.f32 1.0, %v65_v30 }
 0x11a   :  { %v67_v33 = vmul.f32 %v501_v29, %v66_v31 }
 0x11c   :  { %v68_v35 = vadd.f32 %v501_v29, %v67_v33 }
 0x11e   :  { %v72_v37 = vsel %vm71_vm7, %v501_v29, %v68_v35 }
 0x11f   :  { %v77_v38 = vsel %vm74_vm8, %v76_v36, %v72_v37  ;;  %v513_v37 = vmov 0  }
 0x120   :  { %v78_v39 = vmul.f32 %v77_v38, %v54_v23 }
 0x122   :  { %82 = vrot.lane.b32.xlu1 %v78_v39, %s506_s24 }
 0x194   :  { %v83_v40 = vpop.permute.xlu1 %82 }
 0x195   :  { %479 = vmatmul.msk.f32.vlgmr.msra.gmra.mxu0 %vm84_vm9, %v83_v40 }
 0x212   :  { %v568_v41 = vpop.f32.mrf.mxu0 }
 0x213   :  { %v110_v42 = vand.u32 2139095040, %v568_v41  ;;  %v107_v45 = vand.u32 2147483647, %v568_v41  ;;  %vm109_vm6 = vcmp.lt.s32.totalorder %v568_v41, 0 }
 0x215   :  { %v111_v43 = vshrl.u32 %v110_v42, 23  ;;  %v114_v48 = vand.u32 8388607, %v107_v45  ;;  %vm108_vm7 = vcmp.le.f32.partialorder %v107_v45, 0.7853982 }
 0x217   :  { %v480_v44 = vadd.s32 4294967169, %v111_v43  ;;  %v115_v52 = vor.u32 8388608, %v114_v48 }
 0x219   :  { %v117_v46 = vadd.s32 1, %v480_v44  ;;  %v585_v10 = vshll.u32 %v115_v52, 8 }
 0x21b   :  { %vm118_vm10 = vcmp.gt.s32.totalorder %v117_v46, 0  ;;  %v156_v19 = vand.u32 65535, %v585_v10  ;;  %v157_v20 = vshrl.u32 %v585_v10, 16 }
 0x21c   :  { %v119_v47 = vsel %vm118_vm10, %v117_v46, 0 }
 0x21d   :  { %v121_v49 = vand.u32 31, %v119_v47  ;;  %v576_v51 = vshrl.u32 %v119_v47, 5 }
 0x21f   :  { %v574_v50 = vsub.s32 32, %v121_v49  ;;  %v124_v54 = vshll.u32 %v507_v53, %v121_v49  ;;  %v127_v56 = vshll.u32 %v508_v55, %v121_v49  ;;  %v130_v60 = vshll.u32 %v509_v58, %v121_v49 }
 0x220   :  { %v133_v63 = vshll.u32 %v510_v61, %v121_v49  ;;  %v136_v2 = vshll.u32 %v511_v0, %v121_v49  ;;  %vm139_vm11 = vcmp.lt.s32.totalorder %v576_v51, 1  ;;  %vm142_vm12 = vcmp.lt.s32.totalorder %v576_v51, 4 }
 0x221   :  { %v125_v57 = vshrl.u32 %v508_v55, %v574_v50  ;;  %v128_v59 = vshrl.u32 %v509_v58, %v574_v50  ;;  %v131_v62 = vshrl.u32 %v510_v61, %v574_v50  ;;  %v134_v1 = vshrl.u32 %v511_v0, %v574_v50 }
 0x222   :  { %v137_v4 = vshrl.u32 %v512_v3, %v574_v50  ;;  %vm141_vm13 = vcmp.lt.s32.totalorder %v576_v51, 3  ;;  %vm140_vm14 = vcmp.lt.s32.totalorder %v576_v51, 2  ;;  %v123_v48 = vshrl.u32 %v507_v53, %v574_v50 }
 0x223   :  { %v126_v5 = vor.u32 %v125_v57, %v124_v54  ;;  %v129_v6 = vor.u32 %v128_v59, %v127_v56  ;;  %v132_v7 = vor.u32 %v131_v62, %v130_v60  ;;  %v135_v8 = vor.u32 %v134_v1, %v133_v63 }
 0x224   :  { %v138_v9 = vor.u32 %v137_v4, %v136_v2 }
 0x225   :  { %v147_v11 = vsel %vm139_vm11, %v126_v5, %v129_v6  ;;  %v151_v12 = vsel %vm139_vm11, %v129_v6, %v132_v7  ;;  %v148_v13 = vsel %vm142_vm12, %v135_v8, 920167782  ;;  %v144_v44 = vsel %vm142_vm12, %v132_v7, 2102212464 }
 0x226   :  { %v152_v14 = vsel %vm142_vm12, %v138_v9, 1326507024  ;;  %v149_v15 = vsel %vm141_vm13, %v132_v7, %v148_v13  ;;  %v143_v57 = vsel %vm139_vm11, %v123_v48, %v126_v5  ;;  %v145_v58 = vsel %vm141_vm13, %v129_v6, %v144_v44 }
 0x227   :  { %v153_v16 = vsel %vm141_vm13, %v135_v8, %v152_v14  ;;  %v150_v17 = vsel %vm140_vm14, %v147_v11, %v149_v15  ;;  %v146_v50 = vsel %vm140_vm14, %v143_v57, %v145_v58 }
 0x228   :  { %v154_v18 = vsel %vm140_vm14, %v151_v12, %v153_v16  ;;  %v180_v23 = vand.u32 65535, %v150_v17  ;;  %v181_v24 = vshrl.u32 %v150_v17, 16  ;;  %v200_v2 = vmul.u32 %v585_v10, %v146_v50 }
 0x229   :  { %v158_v21 = vand.u32 65535, %v154_v18  ;;  %v159_v22 = vshrl.u32 %v154_v18, 16 }
 0x22a   :  { %v183_v27 = vmul.u32 %v181_v24, %v156_v19  ;;  %v184_v28 = vmul.u32 %v180_v23, %v157_v20  ;;  %v182_v32 = vmul.u32 %v180_v23, %v156_v19  ;;  %v185_v36 = vmul.u32 %v181_v24, %v157_v20 }
 0x22b   :  { %v161_v25 = vmul.u32 %v159_v22, %v156_v19  ;;  %v162_v26 = vmul.u32 %v158_v21, %v157_v20  ;;  %v160_v29 = vmul.u32 %v158_v21, %v156_v19  ;;  %v163_v31 = vmul.u32 %v159_v22, %v157_v20 }
 0x22c   :  { %v186_v33 = vshll.u32 %v183_v27, 16  ;;  %v188_v39 = vshll.u32 %v184_v28, 16  ;;  %v187_v55 = vshrl.u32 %v183_v27, 16  ;;  %v189_v61 = vshrl.u32 %v184_v28, 16 }
 0x22d   :  { %v164_v30 = vshll.u32 %v161_v25, 16  ;;  %v166_v34 = vshll.u32 %v162_v26, 16  ;;  %v165_v49 = vshrl.u32 %v161_v25, 16  ;;  %v167_v59 = vshrl.u32 %v162_v26, 16 }
 0x22e   :  { %vm190_vm0 = vc.u32 %v182_v32, %v186_v33  ;;  %v192_v40 = vadd.s32 %v186_v33, %v182_v32 }
 0x22f   :  { %vm168_vm15 = vc.u32 %v160_v29, %v164_v30  ;;  %v170_v35 = vadd.s32 %v164_v30, %v160_v29  ;;  %v191_v43 = vsel %vm190_vm0, 1, %v513_v37 }
 0x230   :  { %v169_v38 = vsel %vm168_vm15, 1, %v513_v37  ;;  %v193_v47 = vadd.s32 %v191_v43, %v185_v36  ;;  %vm194_vm2 = vc.u32 %v192_v40, %v188_v39  ;;  %v196_v0 = vadd.s32 %v192_v40, %v188_v39 }
 0x231   :  { %v171_v42 = vadd.s32 %v169_v38, %v163_v31  ;;  %vm172_vm1 = vc.u32 %v170_v35, %v166_v34  ;;  %v195_v54 = vsel %vm194_vm2, 1, %v513_v37  ;;  %vm250_vm15 = vweird.f32 %v568_v41 }
 0x232   :  { %v173_v46 = vsel %vm172_vm1, 1, %v513_v37  ;;  %v197_v56 = vadd.s32 %v195_v54, %v193_v47 }
 0x233   :  { %v175_v52 = vadd.s32 %v173_v46, %v171_v42 }
 0x234   :  { %v198_v62 = vadd.s32 %v197_v56, %v187_v55 }
 0x235   :  { %v176_v60 = vadd.s32 %v175_v52, %v165_v49 }
 0x236   :  { %v199_v53 = vadd.s32 %v198_v62, %v189_v61 }
 0x237   :  { %v177_v63 = vadd.s32 %v176_v60, %v167_v59 }
 0x238   :  { %v203_v1 = vadd.s32 1, %v199_v53 }
 0x239   :  { %vm202_vm3 = vc.u32 %v177_v63, %v196_v0  ;;  %v201_v51 = vadd.s32 %v196_v0, %v177_v63 }
 0x23a   :  { %v204_v3 = vsel %vm202_vm3, %v203_v1, %v199_v53 }
 0x23b   :  { %v205_v4 = vadd.s32 %v204_v3, %v200_v2 }
 0x23d   :  { %v206_v5 = vadd.s32 536870912, %v205_v4 }
 0x23f   :  { %v207_v7 = vshrl.u32 %v206_v5, 30 }
 0x241   :  { %v208_v8 = vshll.u32 %v207_v7, 30  ;;  %v231_v27 = vsub.s32 4, %v207_v7 }
 0x243   :  { %v209_v6 = vsub.s32 %v205_v4, %v208_v8  ;;  %v232_v32 = vsel %vm109_vm6, %v231_v27, %v207_v7 }
 0x244   :  { %v234_v35 = vsel %vm108_vm7, 0, %v232_v32 }
 0x245   :  { %vm210_vm4 = vcmp.lt.s32.totalorder %v209_v6, 0  ;;  %v211_v9 = vsub.s32 0, %v209_v6  ;;  %v251_v40 = vadd.s32 3, %v234_v35  ;;  %v406_v46 = vand.u32 3, %v234_v35 }
 0x247   :  { %v212_v11 = vsel %vm210_vm4, %v211_v9, %v209_v6  ;;  %v252_v47 = vand.u32 3, %v251_v40  ;;  %vm407_vm8 = vcmp.lt.s32.totalorder %v406_v46, 2  ;;  %vm408_vm10 = vcmp.eq.s32.totalorder %v406_v46, 0 }
 0x248   :  { %v213_v12 = vclz %v212_v11  ;;  %vm411_vm14 = vcmp.eq.s32.totalorder %v406_v46, 2 }
 0x249   :  { %vm253_vm11 = vcmp.lt.s32.totalorder %v252_v47, 2  ;;  %vm254_vm12 = vcmp.eq.s32.totalorder %v252_v47, 0  ;;  %vm257_vm13 = vcmp.eq.s32.totalorder %v252_v47, 2 }
 0x24a   :  { %v481_v13 = vadd.s32 4294967294, %v213_v12 }
 0x24c   :  { %vm482_vm5 = vcmp.lt.s32.totalorder %v481_v13, 0 }
 0x24d   :  { %v216_v14 = vsel %vm482_vm5, 0, %v481_v13 }
 0x24e   :  { %v217_v15 = vsub.s32 32, %v216_v14  ;;  %v221_v16 = vsub.s32 4294967266, %v216_v14  ;;  %v218_v17 = vshll.u32 %v209_v6, %v216_v14 }
 0x250   :  { %v219_v18 = vshrl.u32 %v201_v51, %v217_v15  ;;  %v222_v19 = vadd.s32 127, %v221_v16 }
 0x252   :  { %v220_v10 = vor.u32 %v219_v18, %v218_v17  ;;  %v223_v20 = vshll.u32 %v222_v19, 23 }
 0x254   :  { %v224_v21 = vor.u32 4788187, %v223_v20  ;;  %v227_v23 = vcvt.s32.f32 %v220_v10 }
 0x256   :  { %v225_v22 = vand.u32 2147483647, %v224_v21 }
 0x258   :  { %v228_v24 = vmul.f32 %v227_v23, %v225_v22 }
 0x25a   :  { %v229_v25 = vxor.u32 2147483648, %v228_v24 }
 0x25c   :  { %v230_v26 = vsel %vm109_vm6, %v229_v25, %v228_v24 }
 0x25d   :  { %v233_v28 = vsel %vm108_vm7, %v568_v41, %v230_v26 }
 0x25e   :  { %v235_v29 = vmul.f32 %v233_v28, %v233_v28 }
 0x260   :  { %v236_v30 = vmul.f32 -0.001358992, %v235_v29  ;;  %v243_v31 = vmul.f32 -0.00019511016, %v235_v29 }
 0x262   :  { %v237_v33 = vadd.f32 0.041655596, %v236_v30  ;;  %v244_v34 = vadd.f32 0.008332121, %v243_v31 }
 0x264   :  { %v238_v36 = vmul.f32 %v237_v33, %v235_v29  ;;  %v245_v37 = vmul.f32 %v244_v34, %v235_v29 }
 0x266   :  { %v239_v38 = vadd.f32 -0.4999988, %v238_v36  ;;  %v246_v39 = vadd.f32 -0.16666654, %v245_v37 }
 0x268   :  { %v240_v42 = vmul.f32 %v239_v38, %v235_v29  ;;  %v247_v43 = vmul.f32 %v246_v39, %v235_v29 }
 0x26a   :  { %v241_v44 = vadd.f32 1.0, %v240_v42  ;;  %v248_v45 = vadd.f32 1.0, %v247_v43 }
 0x26c   :  { %v249_v48 = vmul.f32 %v248_v45, %v233_v28  ;;  %v258_v49 = vxor.u32 2147483648, %v241_v44 }
 0x26e   :  { %v255_v52 = vxor.u32 2147483648, %v249_v48  ;;  %v259_v55 = vsel %vm257_vm13, %v258_v49, %v249_v48  ;;  %v413_v57 = vsel %vm411_vm14, %v258_v49, %v249_v48  ;;  %vm446_vm13 = vcmp.gt.f32.partialorder %v568_v41, 5.497787 }
 0x26f   :  { %vm447_vm14 = vcmp.le.f32.partialorder %v568_v41, 0.7853982 }
 0x270   :  { %v256_v54 = vsel %vm254_vm12, %v241_v44, %v255_v52  ;;  %v410_v56 = vsel %vm408_vm10, %v241_v44, %v255_v52  ;;  %vm453_vm10 = vcmp.le.f32.partialorder %v568_v41, 3.9269907  ;;  %vm450_vm12 = vcmp.le.f32.partialorder %v568_v41, 2.3561945 }
 0x271   :  { %v260_v58 = vsel %vm253_vm11, %v256_v54, %v259_v55  ;;  %v414_v59 = vsel %vm407_vm8, %v410_v56, %v413_v57  ;;  %vm452_vm8 = vcmp.gt.f32.partialorder %v568_v41, 2.3561945  ;;  %vm449_vm11 = vcmp.gt.f32.partialorder %v568_v41, 0.7853982 }
 0x272   :  { %v261_v60 = vsel %vm250_vm15, nan, %v260_v58  ;;  %v415_v61 = vsel %vm250_vm15, nan, %v414_v59  ;;  %vm454_vm15 = vmand %vm452_vm8, %vm453_vm10 }
 0x273   :  { %502 = vrcp.f32 %v415_v61  ;;  %v427_v1 = vand.u32 2147483648, %v415_v61  ;;  %v425_v4 = vand.u32 2147483647, %v415_v61  ;;  %v442_v5 = vand.u32 2147483648, %v261_v60 }
 0x274   :  { %504 = vrcp.f32 %v261_v60  ;;  %v440_v8 = vand.u32 2147483647, %v261_v60  ;;  %vm421_vm2 = vweird.f32 %v415_v61  ;;  %vm436_vm4 = vweird.f32 %v261_v60 }
 0x275   :  { %v428_v9 = vor.u32 1.1754944e-38, %v427_v1  ;;  %vm426_vm5 = vcmp.eq.f32.partialorder %v425_v4, 8.507059e+37  ;;  %v443_v13 = vor.u32 1.1754944e-38, %v442_v5 }
 0x276   :  { %vm441_vm7 = vcmp.eq.f32.partialorder %v440_v8, 8.507059e+37 }
 0x279   :  { %v503_v62 = vpop.eup %502 }
 0x27a   :  { %v505_v63 = vpop.eup %504  ;;  %v417_v0 = vmul.f32 %v503_v62, %v415_v61  ;;  %vm422_vm0 = vweird.f32 %v503_v62 }
 0x27b   :  { %v432_v50 = vmul.f32 %v505_v63, %v261_v60  ;;  %vm437_vm1 = vweird.f32 %v505_v63  ;;  %vm423_vm3 = vmor %vm421_vm2, %vm422_vm0  ;;  %vm468_vm2 = vcmask 261120  }
 0x27c   :  { %v418_v53 = vsub.f32 1.0, %v417_v0  ;;  %vm438_vm6 = vmor %vm436_vm4, %vm437_vm1 }
 0x27d   :  { %v433_v2 = vsub.f32 1.0, %v432_v50  ;;  %vm451_vm0 = vmand %vm449_vm11, %vm450_vm12 }
 0x27e   :  { %v419_v3 = vmul.f32 %v503_v62, %v418_v53  ;;  %vm448_vm1 = vmor %vm446_vm13, %vm447_vm14 }
 0x27f   :  { %v434_v7 = vmul.f32 %v505_v63, %v433_v2 }
 0x280   :  { %v420_v6 = vadd.f32 %v503_v62, %v419_v3 }
 0x281   :  { %v435_v11 = vadd.f32 %v505_v63, %v434_v7 }
 0x282   :  { %v424_v12 = vsel %vm423_vm3, %v503_v62, %v420_v6 }
 0x283   :  { %v429_v14 = vsel %vm426_vm5, %v428_v9, %v424_v12  ;;  %v439_v51 = vsel %vm438_vm6, %v505_v63, %v435_v11 }
 0x284   :  { %v430_v15 = vmul.f32 %v429_v14, %v261_v60  ;;  %v444_v16 = vsel %vm441_vm7, %v443_v13, %v439_v51 }
 0x285   :  { %v445_v17 = vmul.f32 %v444_v16, %v415_v61 }
 0x286   :  { %v459_v18 = vsub.f32 0.0, %v430_v15 }
 0x287   :  { %v455_v19 = vsub.f32 0.0, %v445_v17 }
 0x288   :  { %v460_v10 = vsel %vm454_vm15, %v459_v18, -1.0 }
 0x289   :  { %v456_v20 = vsel %vm454_vm15, -1.0, %v455_v19  ;;  %v461_v21 = vsel %vm451_vm0, 1.0, %v460_v10 }
 0x28a   :  { %v462_v22 = vsel %vm448_vm1, %v430_v15, %v461_v21  ;;  %v457_v23 = vsel %vm451_vm0, %v445_v17, %v456_v20 }
 0x28b   :  { %464 = vrot.lane.b32.xlu1 %v462_v22, %s506_s24  ;;  %v458_v24 = vsel %vm448_vm1, 1.0, %v457_v23 }
 0x2fd   :  { %v465_v25 = vpop.permute.xlu1 %464 }
 0x2fe   :  { %v467_v26 = vsel %vm84_vm9, %v458_v24, %v465_v25 }
 0x2ff   :  { %v469_v27 = vsel %vm468_vm2, %v467_v26, 0.0 }
 0x300   :  { %470 = vst [vmem:[%s640_s5] sm:$0xf] %v469_v27 }

// kernel: custom-call.8
= control target key start
LH: loop header
LB: loop body
LE: loop exit
PB: predicated region body
PF: predicated region fallthrough
CT: control target
= control target key end

     0   :  { %5 = vsyncpa [#allocation4], 0  ;;  %s987_s0 = inlined_call_operand.vmem [shape: f32[4,9,9], index: 0, kind: input, shape index: {}]   ;;  %s988_s1 = inlined_call_operand.vmem [shape: f32[4,9,9], index: 1, kind: output, shape index: {0}]   ;;  %s989_s2 = inlined_call_operand.hbm [shape: s32[4,9], index: 2, kind: output, shape index: {1}]   ;;  %s990_s3 = inlined_call_operand.vmem [shape: s32[4,9], index: 3, kind: output, shape index: {2}]  }
   0x1   :  { %7 = vsyncpa [#allocation4 + $0x1], 0  ;;  %s784_s12 = smov 0   ;;  %s786_s13 = smov 0  }
   0x2   :  { %s788_s14 = smov 0   ;;  %s790_s15 = smov 0  }
   0x3 LB: > { %s805_s16 = sadd.s32 4294967295, %s753_s15   ;;  %s595_s17 = sadd.s32 4294967294, %s753_s15   ;;  %s753_s15 = sphi %s790_s15, %s996_s15   ;;  %s749_s14 = sphi %s788_s14, %s995_s14   ;;  %s745_s13 = sphi %s786_s13, %s994_s13   ;;  %s741_s12 = sphi %s784_s12, %s993_s12  }
   0x4   : > { %s809_s18 = sadd.s32 1, %s753_s15   ;;  %s17_s19 = sshrl.u32 %s753_s15, 3 }
   0x5   : > { %s18_s20 = sshrl.u32 %s809_s18, 3  ;;  %s22_s21 = sadd.s32 1, %s749_s14 }
   0x6   : > { %s19_s22 = ssub.s32 %s17_s19, %s18_s20  ;;  %p32_p0 = scmp.ne.s32.totalorder %s749_s14, %s745_s13 }
   0x7   : > { %p20_p1 = scmp.eq.s32.totalorder %s19_s22, 0  ;;  %p33_p2 = scmp.eq.s32.totalorder %s805_s16, 3 }
   0x8   : > { %p38_p3 = scmp.ne.s32.totalorder %s745_s13, %s741_s12  ;;  %p39_p4 = scmp.eq.s32.totalorder %s595_s17, 3 }
   0x9   : > { %s820_s23 = scalar_select %p20_p1, %s749_s14, %s22_s21  }
   0xa   : > { %p822_p5 = por %p33_p2, %p32_p0  ;;  %p826_p6 = por %p39_p4, %p38_p3 }
   0xb   : > { %p597_p7 = scmp.ge.s32.totalorder %s753_s15, 4 }
   0xc   : > { %s85_s26 = sand.u32 (!%p597_p7), 1, %s753_s15   ;;  %s599_s27 = sshll.u32 (!%p597_p7), %s753_s15, 4 }
   0xd   : > { %83 = sbr.rel (%p597_p7) target bundleno = 21 (0x15), region = 16  ;;  %s598_s28 = sshll.u32 (!%p597_p7), %s85_s26, 4 }
   0xe   : > { %s89_s4 = scalar_lea.vmem (!%p597_p7), %s987_s0, %s599_s27  ;;  %s87_s5 = scalar_lea.vmem (!%p597_p7), [#allocation0], %s598_s28 }
  0x12   : > { %v102_v0 = vld [vmem:[%s89_s4] sm:$0xff]  ;;  %v104_v1 = vld [vmem:[%s89_s4 + $0x8] sm:$0xff] }
  0x13   : > { %103 = vst [vmem:[%s87_s5] sm:$0xff] %v102_v0 }
  0x14   : > { %105 = vst [vmem:[%s87_s5 + $0x8] sm:$0xff] %v104_v1 }
  0x15 PF: > { %p600_p8 = scmp.ge.s32.totalorder %s753_s15, 1  ;;  %p110_p9 = scmp.lt.s32.totalorder %s753_s15, 5 }
  0x17   : > { %p111_p10 = pnand %p600_p8, %p110_p9 }
  0x19   : > { %114 = sbr.rel (%p111_p10) target bundleno = 485 (0x1e5), region = 39 }
  0x1e   : > { %s117_s6 = sand.u32 1, %s805_s16   ;;  %s132_s7 = sand.u32 1, %s745_s13   ;;  %v154_v2 = vlaneseq  ;;  %v763_v6 = vmov 0  }
  0x1f   : > { %s601_s8 = sshll.u32 %s117_s6, 4  ;;  %s842_s9 = sshll.u32 %s132_s7, 2 }
  0x20   : > { %v845_v3 = vshrl.u32 %v154_v2, 7  ;;  %s119_s10 = scalar_lea.vmem [#allocation0], %s601_s8  ;;  %s847_s11 = scalar_lea.vmem [#allocation1], %s601_s8 }
  0x21   : > { %v143_v4 = vld [vmem:[%s119_s10] sm:$0xff]  ;;  %v605_v5 = vld [vmem:[%s119_s10 + $0x8] sm:$0xff]  ;;  %s149_s17 = sand.u32 7, %s805_s16   ;;  %s134_s20 = scalar_lea.vmem [#allocation3], %s842_s9 }
  0x22   : > { %144 = vst [vmem:[%s847_s11] sm:$0xff] %v143_v4  ;;  %s852_s19 = scalar_lea.vmem [#allocation2], %s149_s17  ;;  %s140_s21 = scalar_lea.vmem [#allocation6], %s842_s9 }
  0x23   : > { %606 = vst [vmem:[%s847_s11 + $0x8] sm:$0xff] %v605_v5  ;;  %s857_s22 = scalar_lea.vmem [#allocation5], %s149_s17  ;;  %s755_s26 = smov 0  }
  0x24   : > { %153 = vst [vmem:[%s852_s19] sm:$0x1] %v763_v6 }
  0x25 LB: >> { %s607_s27 = sshll.u32 %s757_s26, 3  ;;  %s162_s26 = sadd.s32 1, %s757_s26   ;;  %s757_s26 = sphi %s755_s26, %s162_s26  }
  0x26   : >> { %v166_v7 = vstv %s607_s27  ;;  %s164_s28 = scalar_lea.vmem [#allocation7], %s607_s27  ;;  %p159_p11 = scmp.ge.s32.totalorder %s162_s26, 2  }
  0x27   : >> { %v167_v8 = vadd.s32 %v166_v7, %v845_v3  ;;  %s860_s29 = smov (%p159_p11), 0  }
  0x28   : > { %161 = sbr.rel (!%p159_p11) target bundleno = 37 (0x25), region = 191 }
  0x29   : >> { %168 = vst [vmem:[%s164_s28] sm:$0xff] %v167_v8 }
  0x2d LB: >> { %v179_v9 = vld [vmem:[%s847_s11] sm:$0xff]  ;;  %v610_v10 = vld [vmem:[%s847_s11 + $0x8] sm:$0xff]  ;;  %v868_v11 = vadd.s32 8, %v845_v3  ;;  %v871_v13 = vstv %s761_s29  ;;  %s237_s30 = ssub.s32 128, %s761_s29  ;;  %v883_v47 = vand.u32 127, %v154_v2  ;;  %s249_s4 = scalar_lea.vmem %s847_s11, %s761_s29 [#allocation1]  ;;  %s761_s29 = sphi %s860_s29, %s174_s29  }
  0x2e   : >> { %v180_v12 = vand.u32 2147483647, %v179_v9  ;;  %v192_v14 = vand.u32 2147483647, %v610_v10  ;;  %vm183_vm1 = vcmp.ge.s32.totalorder %v845_v3, %v871_v13  ;;  %v246_v48 = vld [vmem:[%s852_s19] ss:$0 sm:$0xff] }
  0x2f   : >> { %vm196_vm0 = vcmp.lt.s32.totalorder %v868_v11, 9  ;;  %vm195_vm3 = vcmp.ge.s32.totalorder %v868_v11, %v871_v13  ;;  %vm244_vm15 = vcmp.eq.s32.totalorder %v883_v47, %v871_v13  ;;  %v251_v49 = vld [vmem:[%s249_s4] ss:$0 sm:$0xff]  ;;  %s255_s8 = scalar_lea.vmem [#allocation7], %s761_s29  ;;  %s174_s29 = sadd.s32 1, %s761_s29  }
  0x30   : >> { %vm609_vm2 = vcmp.gt.f32.partialorder %v180_v12, -inf  ;;  %vm197_vm5 = vmand %vm195_vm3, %vm196_vm0  ;;  %v257_v53 = vld [vmem:[%s255_s8] ss:$0 sm:$0xff]  ;;  %p171_p12 = scmp.ge.s32.totalorder %s174_s29, 9  }
  0x31   : >> { %vm187_vm4 = vmand %vm183_vm1, %vm609_vm2  ;;  %vm303_vm1 = vcmp.gt.s32.totalorder %v868_v11, %v871_v13  ;;  %vm275_vm2 = vcmp.gt.s32.totalorder %v845_v3, %v871_v13  ;;  %s426_s17 = sshrl.u32 (%p171_p12), %s805_s16, 3 }
  0x32   : >> { %v188_v15 = vsel %vm187_vm4, %v845_v3, %v871_v13  ;;  %v189_v16 = vsel %vm187_vm4, %v180_v12, -inf  ;;  %s931_s26 = sshll.u32 (%p171_p12), %s426_s17, 2 }
  0x33   : >> { %vm198_vm6 = vcmp.lt.f32.partialorder %v189_v16, %v192_v14  ;;  %s430_s29 = scalar_lea.hbm (%p171_p12), %s989_s2, %s931_s26 }
  0x34   : >> { %vm199_vm7 = vmand %vm197_vm5, %vm198_vm6 }
  0x35   : >> { %v200_v17 = vsel %vm199_vm7, %v868_v11, %v188_v15  ;;  %v201_v18 = vsel %vm199_vm7, %v192_v14, %v189_v16 }
  0x36   : >> { %v202_v19 = vrot.slane %v201_v18, 1  ;;  %v203_v20 = vrot.slane %v200_v17, 1 }
  0x38   : >> { %vm204_vm8 = vcmp.ge.f32.partialorder %v202_v19, %v201_v18  ;;  %v207_v21 = vrot.slane %v202_v19, 1  ;;  %v208_v22 = vrot.slane %v203_v20, 1 }
  0x39   : >> { %v205_v23 = vsel %vm204_vm8, %v202_v19, %v201_v18  ;;  %v206_v24 = vsel %vm204_vm8, %v203_v20, %v200_v17 }
  0x3a   : >> { %vm209_vm9 = vcmp.ge.f32.partialorder %v207_v21, %v205_v23  ;;  %v212_v25 = vrot.slane %v207_v21, 1  ;;  %v213_v26 = vrot.slane %v208_v22, 1 }
  0x3b   : >> { %v210_v27 = vsel %vm209_vm9, %v207_v21, %v205_v23  ;;  %v211_v28 = vsel %vm209_vm9, %v208_v22, %v206_v24 }
  0x3c   : >> { %vm214_vm10 = vcmp.ge.f32.partialorder %v212_v25, %v210_v27  ;;  %v217_v29 = vrot.slane %v212_v25, 1  ;;  %v218_v30 = vrot.slane %v213_v26, 1 }
  0x3d   : >> { %v215_v31 = vsel %vm214_vm10, %v212_v25, %v210_v27  ;;  %v216_v32 = vsel %vm214_vm10, %v213_v26, %v211_v28 }
  0x3e   : >> { %vm219_vm11 = vcmp.ge.f32.partialorder %v217_v29, %v215_v31  ;;  %v222_v33 = vrot.slane %v217_v29, 1  ;;  %v223_v34 = vrot.slane %v218_v30, 1 }
  0x3f   : >> { %v220_v35 = vsel %vm219_vm11, %v217_v29, %v215_v31  ;;  %v221_v36 = vsel %vm219_vm11, %v218_v30, %v216_v32  ;;  %vm320_vm11 = vmand %vm303_vm1, %vm244_vm15 }
  0x40   : >> { %vm224_vm12 = vcmp.ge.f32.partialorder %v222_v33, %v220_v35  ;;  %v227_v37 = vrot.slane %v222_v33, 1  ;;  %v228_v38 = vrot.slane %v223_v34, 1 }
  0x41   : >> { %v225_v39 = vsel %vm224_vm12, %v222_v33, %v220_v35  ;;  %v226_v40 = vsel %vm224_vm12, %v223_v34, %v221_v36 }
  0x42   : >> { %vm229_vm13 = vcmp.ge.f32.partialorder %v227_v37, %v225_v39  ;;  %v232_v41 = vrot.slane %v227_v37, 1  ;;  %v233_v42 = vrot.slane %v228_v38, 1 }
  0x43   : >> { %v230_v43 = vsel %vm229_vm13, %v227_v37, %v225_v39  ;;  %v231_v44 = vsel %vm229_vm13, %v228_v38, %v226_v40  ;;  %vm292_vm13 = vmand %vm275_vm2, %vm244_vm15 }
  0x44   : >> { %vm234_vm14 = vcmp.ge.f32.partialorder %v232_v41, %v230_v43 }
  0x45   : >> { %v236_v45 = vsel %vm234_vm14, %v233_v42, %v231_v44  ;;  %vm267_vm14 = vcmp.gt.s32.totalorder %v883_v47, %v871_v13 }
  0x46   : >> { %238 = vrot.lane.b32.xlu0 %v236_v45, %s237_s30  ;;  %s616_s30 = sshll.u32 (%p171_p12), %s805_s16, 4 }
  0xb8   : >> { %v239_v46 = vpop.permute.xlu0 %238 }
  0xb9   : >> { %621 = vpush %v239_v46 }
  0xea   : >> { %s622_s5 = spop %621 }
  0xeb   : >> { %v245_v50 = vstv %s622_s5  ;;  %s250_s6 = scalar_lea.vmem %s847_s11, %s622_s5 [#allocation1]  ;;  %s256_s10 = scalar_lea.vmem [#allocation7], %s622_s5 }
  0xec   : >> { %v247_v51 = vsel %vm244_vm15, %v245_v50, %v246_v48  ;;  %v252_v52 = vld [vmem:[%s250_s6] ss:$0 sm:$0xff] }
  0xed   : >> { %248 = vst [vmem:[%s852_s19] sm:$0x1] %v247_v51  ;;  %v258_v54 = vld [vmem:[%s256_s10] ss:$0 sm:$0xff]  ;;  %vm261_vm0 = vcmp.ne.f32.partialorder %v252_v52, 0.0  ;;  %v268_v11 = vsel %vm267_vm14, %v252_v52, 0.0  ;;  %s432_s19 = sshll.u32 (%p171_p12), %s134_s20, 4  ;;  %s433_s19 = int_to_ptr.vmem [resolvable:$true] %s432_s19 }
  0xee   : >> { %253 = vst [vmem:[%s250_s6] sm:$0x1] %v251_v49  ;;  %vm262_vm3 = vmand %vm244_vm15, %vm261_vm0 }
  0xef   : >> { %254 = vst [vmem:[%s249_s4] sm:$0x1] %v252_v52  ;;  %v263_v55 = vsel %vm262_vm3, %v252_v52, 1.0  ;;  %s434_s4 = sshll.u32 (%p171_p12), %s430_s29, 4  ;;  %s703_s29 = scalar_lea.hbm (%p171_p12), %s989_s2, 4  ;;  %s435_s4 = int_to_ptr.hbm [resolvable:$true] %s434_s4 }
  0xf0   : >> { %259 = vst [vmem:[%s256_s10] sm:$0x1] %v257_v53  ;;  %v304_v56 = vsel %vm303_vm1, %v263_v55, 1.0  ;;  %v276_v57 = vsel %vm275_vm2, %v263_v55, 1.0  ;;  %s394_s10 = scalar_lea.sflag (%p171_p12), [#allocation4], %s132_s7  ;;  %s697_s17 = sshra.s32 (%p171_p12), %s435_s4, 4  ;;  %s698_s17 = int_to_ptr.hbm [resolvable:$true] %s697_s17 }
  0xf1   : >> { %260 = vst [vmem:[%s255_s8] sm:$0x1] %v258_v54  ;;  %679 = vrcp.f32 %v304_v56  ;;  %v316_v63 = vand.u32 2147483648, %v304_v56  ;;  %v314_v4 = vand.u32 2147483647, %v304_v56  ;;  %v288_v5 = vand.u32 2147483648, %v276_v57  ;;  %s403_s8 = scalar_lea.vmem (%p171_p12), %s988_s1, %s616_s30  ;;  %s699_s16 = scalar_lea.hbm (%p171_p12), %s698_s17, 4 }
  0xf2   : >> { %681 = vrcp.f32 %v276_v57  ;;  %v286_v7 = vand.u32 2147483647, %v276_v57  ;;  %vm310_vm6 = vweird.f32 %v304_v56  ;;  %vm282_vm8 = vweird.f32 %v276_v57  ;;  %p700_p13 = scmp.ne.s32.totalorder (%p171_p12), %s698_s17, %s699_s16  ;;  %p704_p2 = scmp.lt.s32.totalorder (%p171_p12), %s698_s17, %s989_s2 }
  0xf3   : >> { %v317_v9 = vor.u32 1.1754944e-38, %v316_v63  ;;  %vm315_vm9 = vcmp.eq.f32.partialorder %v314_v4, 8.507059e+37  ;;  %v289_v14 = vor.u32 1.1754944e-38, %v288_v5  ;;  %p705_p3 = scmp.lt.s32.totalorder (%p171_p12), %s703_s29, %s699_s16 }
  0xf4   : >> { %vm287_vm12 = vcmp.eq.f32.partialorder %v286_v7, 8.507059e+37  ;;  %v379_v2 = vld [vmem:[#allocation2] sm:$0xf] (%p171_p12)  ;;  %p701_p0 = pnand (%p171_p12), %p700_p13, %p822_p5 }
  0xf5   : > { %382 = vst [vmem:[%s134_s20] sm:$0xf] (%p171_p12), %v379_v2  ;;  %p706_p4 = por (%p171_p12), %p705_p3, %p704_p2 }
  0xf6   : >> { %v611_v15 = vld [vmem:[%s847_s11 + $0x8] sm:$0xff]  ;;  %v272_v19 = vld [vmem:[%s847_s11] sm:$0xff]  ;;  %p702_p1 = pneg (%p171_p12), %p701_p0 }
  0xf7   : >> { %v680_v58 = vpop.eup %679 }
  0xf8   : >> { %v682_v59 = vpop.eup %681  ;;  %v306_v60 = vmul.f32 %v680_v58, %v304_v56  ;;  %vm311_vm4 = vweird.f32 %v680_v58  ;;  %v327_v30 = vld [vmem:[#allocation7] sm:$0xff] (%p171_p12)  ;;  %v329_v13 = vld [vmem:[#allocation7 + $0x8] sm:$0xff] (%p171_p12)  ;;  %p707_p7 = pnand (%p171_p12), %p706_p4, %p702_p1 }
  0xf9   : >> { %v278_v61 = vmul.f32 %v682_v59, %v276_v57  ;;  %vm283_vm5 = vweird.f32 %v682_v59  ;;  %vm312_vm7 = vmor %vm310_vm6, %vm311_vm4 }
  0xfa   : >> { %v307_v62 = vsub.f32 1.0, %v306_v60  ;;  %vm284_vm10 = vmor %vm282_vm8, %vm283_vm5 }
  0xfb   : >> { %v279_v0 = vsub.f32 1.0, %v278_v61 }
  0xfc   : >> { %v308_v1 = vmul.f32 %v680_v58, %v307_v62 }
  0xfd   : >> { %v280_v6 = vmul.f32 %v682_v59, %v279_v0 }
  0xfe   : >> { %v309_v8 = vadd.f32 %v680_v58, %v308_v1 }
  0xff   : >> { %v281_v10 = vadd.f32 %v682_v59, %v280_v6 }
 0x100   : >> { %v313_v12 = vsel %vm312_vm7, %v680_v58, %v309_v8 }
 0x101   : >> { %v318_v16 = vsel %vm315_vm9, %v317_v9, %v313_v12  ;;  %v285_v17 = vsel %vm284_vm10, %v682_v59, %v281_v10 }
 0x102   : >> { %v319_v18 = vmul.f32 %v611_v15, %v318_v16  ;;  %v290_v20 = vsel %vm287_vm12, %v289_v14, %v285_v17 }
 0x103   : >> { %v291_v21 = vmul.f32 %v290_v20, %v272_v19 }
 0x104   : >> { %v321_v22 = vsel %vm320_vm11, %v319_v18, 0.0 }
 0x105   : >> { %322 = vadd.xlane.f32.xlu1 %v321_v22  ;;  %v293_v23 = vsel %vm292_vm13, %v291_v21, 0.0 }
 0x106   : >> { %294 = vadd.xlane.f32.xlu0 %v293_v23 }
 0x12f   : > { %344 = vxpose.xlu0.b32.start [1/2] (short) (narrow) (%p171_p12), %v327_v30, 8 }
 0x137   : > { %345 = vxpose.xlu0.b32.end [2/2] (short) (narrow) (%p171_p12), %v329_v13, 8 }
 0x178   : >> { %v323_v24 = vpop.xlane.xlu1 %322 }
 0x179   : >> { %v324_v25 = vmul.f32 %v323_v24, %v268_v11  ;;  %v295_v26 = vpop.xlane.xlu0 %294 }
 0x17a   : >> { %v296_v27 = vmul.f32 %v295_v26, %v268_v11  ;;  %173 = sbr.rel (!%p171_p12) target bundleno = 45 (0x2d), region = 202 }
 0x17b   : >> { %v325_v28 = vsub.f32 %v319_v18, %v324_v25 }
 0x17c   : >> { %v297_v29 = vsub.f32 %v291_v21, %v296_v27 }
 0x17d   : >> { %612 = vst [vmem:[%s847_s11 + $0x8] sm:$0xff] %v325_v28 }
 0x17e   : >> { %298 = vst [vmem:[%s847_s11] sm:$0xff] %v297_v29 }
 0x184   : > { %v418_v31 = vld [vmem:[%s847_s11 + $0x8] sm:$0xff] }
 0x185   : > { %v416_v3 = vld [vmem:[%s847_s11] sm:$0xff] }
 0x186   : > { %417 = vst [vmem:[%s403_s8] sm:$0xff] %v416_v3 }
 0x187   : > { %710 = shalt.err (!%p707_p7)
}
 0x188   : > { %623 = dma.vmem_to_hbm [thread:$0]  (%p822_p5), %s433_s19, 64, %s435_s4, %s394_s10   ;;  %419 = vst [vmem:[%s403_s8 + $0x8] sm:$0xff] %v418_v31 }
 0x189   : > { %s443_s20 = scalar_lea.vmem (%p822_p5), %s990_s3, %s931_s26 }
 0x1d3   : > { %v360_v32 = vpop.trf.xlu0 }
 0x1d4   : > { %376 = vst [vmem:[%s857_s22] sm:$0x1] %v360_v32 }
 0x1d8   : > { %440 = sbr.rel (!%p822_p5) target bundleno = 485 (0x1e5), region = 80 }
 0x1db   : > { %v385_v33 = vld [vmem:[#allocation5] sm:$0xf] }
 0x1dc   : > { %388 = vst [vmem:[%s140_s21] sm:$0xf] %v385_v33 }
 0x1e3   : > { %v460_v34 = vld [vmem:[%s140_s21] sm:$0xf] }
 0x1e4   : > { %461 = vst [vmem:[%s443_s20] sm:$0xf] %v460_v34 }
 0x1e5 PF: > { %p629_p8 = scmp.ge.s32.totalorder %s753_s15, 2  ;;  %s489_s22 = sand.u32 1, %s741_s12  }
 0x1e6   : > { %s490_s24 = scalar_lea.sflag [#allocation4], %s489_s22 }
 0x1e7   : > { %p626_p9 = pnand %p629_p8, %p826_p6 }
 0x1e9   : > { %p627_p10 = pneg %p626_p9 }
 0x1eb   : > { %736 = dma.done.wait (%p627_p10), %s490_s24, 64  }
 0x1ec   : > { %738 = vsyncadd (%p627_p10), %s490_s24, 4294967232  ;;  %p10_p5 = scmp.ge.s32.totalorder %s809_s18, 6   ;;  %s993_s12 = smov %s745_s13 }
 0x1ed   : > { %s994_s13 = smov %s749_s14  ;;  %s995_s14 = smov %s820_s23 }
 0x1ee   : > { %s996_s15 = smov %s809_s18  ;;  %12 = sbr.rel (!%p10_p5) target bundleno = 3 (0x3), region = 213 }
 0x1f3   :  { %503 = vsyncpa [#allocation4], 1 }
 0x1f4   :  { %505 = vsyncpa [#allocation4 + $0x1], 1 }

// kernel: custom-call.10
= control target key start
LH: loop header
LB: loop body
LE: loop exit
PB: predicated region body
PF: predicated region fallthrough
CT: control target
= control target key end

     0   :  { %s508_s6 = smov 0   ;;  %s510_s7 = smov 0   ;;  %s595_s0 = inlined_call_operand.vmem [shape: f32[4,1,9,9], index: 0, kind: input, shape index: {}]   ;;  %s596_s1 = inlined_call_operand.vmem [shape: f32[4,1,9,9], index: 1, kind: output, shape index: {}]  }
   0x1   :  { %s512_s8 = smov 0  }
   0x2 LB: > { %s424_s9 = sadd.s32 4294967295, %s494_s8   ;;  %s33_s10 = sadd.s32 1, %s490_s7  ;;  %s494_s8 = sphi %s512_s8, %s7_s8   ;;  %s490_s7 = sphi %s510_s7, %s598_s7   ;;  %s486_s6 = sphi %s508_s6, %s597_s6  }
   0x3   : > { %p35_p0 = scmp.ge.s32.totalorder %s33_s10, 4  ;;  %p426_p1 = scmp.ge.s32.totalorder %s494_s8, 4 }
   0x4   : > { %s49_s11 = sand.u32 (!%p426_p1), 1, %s494_s8   ;;  %s440_s12 = sshll.u32 (!%p426_p1), %s490_s7, 4 }
   0x5   : > { %s600_s10 = smov (%p35_p0, %s33_s10), 0  ;;  %47 = sbr.rel (%p426_p1) target bundleno = 13 (0xd), region = 16 }
   0x6   : > { %s427_s13 = sshll.u32 (!%p426_p1), %s49_s11, 4  ;;  %s58_s16 = scalar_lea.vmem (!%p426_p1), %s595_s0, %s440_s12 }
   0x7   : > { %s51_s17 = scalar_lea.vmem (!%p426_p1), [#allocation0], %s427_s13 }
   0xa   : > { %v89_v0 = vld [vmem:[%s58_s16] sm:$0xff]  ;;  %v91_v1 = vld [vmem:[%s58_s16 + $0x8] sm:$0xff] }
   0xb   : > { %90 = vst [vmem:[%s51_s17] sm:$0xff] %v89_v0 }
   0xc   : > { %92 = vst [vmem:[%s51_s17 + $0x8] sm:$0xff] %v91_v1 }
   0xd PF: > { %p430_p2 = scmp.ge.s32.totalorder %s494_s8, 1  ;;  %p97_p3 = scmp.lt.s32.totalorder %s494_s8, 5 }
   0xf   : > { %p98_p4 = pnand %p430_p2, %p97_p3 }
  0x11   : > { %101 = sbr.rel (%p98_p4) target bundleno = 1129 (0x469), region = 54 }
  0x16   : > { %s104_s18 = sand.u32 1, %s424_s9   ;;  %v115_v2 = vlaneseq  ;;  %v496_v20 = vmov -1.0   ;;  %v497_v63 = vmov 0.0   ;;  %s441_s21 = sshll.u32 %s486_s6, 4 }
  0x17   : > { %s431_s19 = sshll.u32 %s104_s18, 4  ;;  %s323_s24 = scalar_lea.vmem %s596_s1, %s441_s21 }
  0x18   : > { %v535_v3 = vand.u32 127, %v115_v2  ;;  %v119_v4 = vshrl.u32 %v115_v2, 7  ;;  %s537_s20 = scalar_lea.vmem [#allocation0], %s431_s19 }
  0x19   : > { %v122_v5 = vld [vmem:[%s537_s20] sm:$0xff]  ;;  %v433_v42 = vld [vmem:[%s537_s20 + $0x8] sm:$0xff] }
  0x1a   : > { %vm121_vm0 = vcmp.eq.s32.totalorder %v119_v4, %v535_v3  ;;  %vm117_vm1 = vcmp.lt.s32.totalorder %v535_v3, 9  ;;  %vm126_vm2 = vcmp.ge.s32.totalorder %v119_v4, %v535_v3  ;;  %vm182_vm8 = vcmp.eq.s32.totalorder %v535_v3, 0 }
  0x1b   : > { %v123_v6 = vsel %vm121_vm0, %v122_v5, 0.0  ;;  %vm127_vm3 = vmand %vm126_vm2, %vm117_vm1  ;;  %vm179_vm9 = vcmp.eq.s32.totalorder %v535_v3, %v119_v4  ;;  %v183_v21 = vsel %vm182_vm8, 1.0, %v496_v20  ;;  %vm197_vm10 = vcmp.eq.s32.totalorder %v535_v3, 1 }
  0x1c   : > { %124 = vadd.xlane.f32.xlu0 %v123_v6  ;;  %v128_v15 = vsel %vm127_vm3, %v122_v5, 0.0  ;;  %v184_v22 = vsel %vm179_vm9, %v183_v21, 0.0  ;;  %vm207_vm11 = vcmp.eq.s32.totalorder %v535_v3, 2  ;;  %vm217_vm12 = vcmp.eq.s32.totalorder %v535_v3, 3 }
  0x1d   : > { %v149_v41 = vadd.s32 8, %v119_v4  ;;  %vm227_vm14 = vcmp.eq.s32.totalorder %v535_v3, 4  ;;  %vm237_vm8 = vcmp.eq.s32.totalorder %v535_v3, 5  ;;  %vm267_vm9 = vcmp.eq.s32.totalorder %v535_v3, 8 }
  0x1f   : > { %vm150_vm13 = vcmp.eq.s32.totalorder %v149_v41, %v535_v3  ;;  %vm155_vm15 = vcmp.ge.s32.totalorder %v149_v41, %v535_v3 }
  0x20   : > { %v152_v43 = vsel %vm150_vm13, %v433_v42, 0.0  ;;  %vm156_vm3 = vmand %vm155_vm15, %vm117_vm1  ;;  %vm247_vm1 = vcmp.eq.s32.totalorder %v535_v3, 6 }
  0x21   : > { %v157_v58 = vsel %vm156_vm3, %v433_v42, 0.0 }
  0x8f   : > { %v541_v7 = vpop.xlane.xlu0 %124 }
  0x90   : > { %468 = vrcp.f32 %v541_v7  ;;  %v140_v11 = vand.u32 2147483648, %v541_v7  ;;  %v138_v13 = vand.u32 2147483647, %v541_v7  ;;  %vm134_vm5 = vweird.f32 %v541_v7 }
  0x92   : > { %v141_v16 = vor.u32 1.1754944e-38, %v140_v11  ;;  %vm139_vm7 = vcmp.eq.f32.partialorder %v138_v13, 8.507059e+37 }
  0x96   : > { %v469_v8 = vpop.eup %468 }
  0x97   : > { %v130_v9 = vmul.f32 %v469_v8, %v541_v7  ;;  %vm135_vm4 = vweird.f32 %v469_v8 }
  0x98   : > { %vm136_vm6 = vmor %vm134_vm5, %vm135_vm4 }
  0x99   : > { %v131_v10 = vsub.f32 1.0, %v130_v9 }
  0x9b   : > { %v132_v12 = vmul.f32 %v469_v8, %v131_v10 }
  0x9d   : > { %v133_v14 = vadd.f32 %v469_v8, %v132_v12 }
  0x9f   : > { %v137_v17 = vsel %vm136_vm6, %v469_v8, %v133_v14 }
  0xa0   : > { %v554_v18 = vsel %vm139_vm7, %v141_v16, %v137_v17  ;;  %vm190_vm7 = vcmp.eq.s32.totalorder %v535_v3, %v149_v41 }
  0xa1   : > { %v143_v19 = vmul.f32 %v554_v18, %v128_v15  ;;  %v191_v0 = vsel %vm190_vm7, -1.0, %v497_v63 }
  0xa3   : > { %144 = vst [vmem:[#allocation2] sm:$0xff] %v143_v19 }
  0xaa   : > { %v193_v23 = vld [vmem:[#allocation2 + $0x1] ss:$0 sm:$0xff]  ;;  %v203_v26 = vld [vmem:[#allocation2 + $0x2] ss:$0 sm:$0xff]  ;;  %v213_v31 = vld [vmem:[#allocation2 + $0x3] ss:$0 sm:$0xff] }
  0xab   : > { %v194_v24 = vxor.u32 2147483648, %v193_v23  ;;  %v204_v28 = vxor.u32 2147483648, %v203_v26  ;;  %v214_v33 = vxor.u32 2147483648, %v213_v31  ;;  %v223_v36 = vld [vmem:[#allocation2 + $0x4] ss:$0 sm:$0xff] }
  0xac   : > { %v224_v38 = vxor.u32 2147483648, %v223_v36  ;;  %v233_v44 = vld [vmem:[#allocation2 + $0x5] ss:$0 sm:$0xff]  ;;  %v243_v62 = vld [vmem:[#allocation2 + $0x6] ss:$0 sm:$0xff] }
  0xad   : > { %v198_v25 = vmul.f32 %v194_v24, %v184_v22  ;;  %v234_v46 = vxor.u32 2147483648, %v233_v44  ;;  %v244_v4 = vxor.u32 2147483648, %v243_v62  ;;  %v253_v10 = vld [vmem:[#allocation2 + $0x7] ss:$0 sm:$0xff] }
  0xae   : > { %v254_v12 = vxor.u32 2147483648, %v253_v10 }
  0xaf   : > { %199 = vadd.xlane.f32.xlu0 %v198_v25 }
 0x122   : > { %v200_v27 = vpop.xlane.xlu0 %199 }
 0x123   : > { %v201_v29 = vsel %vm197_vm10, %v200_v27, %v184_v22  ;;  %vm257_vm10 = vcmp.eq.s32.totalorder %v535_v3, 7 }
 0x124   : > { %v208_v30 = vmul.f32 %v204_v28, %v201_v29 }
 0x126   : > { %209 = vadd.xlane.f32.xlu1 %v208_v30 }
 0x199   : > { %v210_v32 = vpop.xlane.xlu1 %209 }
 0x19a   : > { %v211_v34 = vsel %vm207_vm11, %v210_v32, %v201_v29 }
 0x19b   : > { %v218_v35 = vmul.f32 %v214_v33, %v211_v34 }
 0x19d   : > { %219 = vadd.xlane.f32.xlu1 %v218_v35 }
 0x1a5   : > { %153 = vadd.xlane.f32.xlu1 %v152_v43 }
 0x210   : > { %v220_v37 = vpop.xlane.xlu1 %219 }
 0x211   : > { %v221_v39 = vsel %vm217_vm12, %v220_v37, %v211_v34 }
 0x212   : > { %v228_v40 = vmul.f32 %v224_v38, %v221_v39 }
 0x214   : > { %229 = vadd.xlane.f32.xlu2 %v228_v40 }
 0x218   : > { %v154_v49 = vpop.xlane.xlu1 %153 }
 0x219   : > { %470 = vrcp.f32 %v154_v49  ;;  %v169_v52 = vand.u32 2147483648, %v154_v49  ;;  %vm163_vm0 = vweird.f32 %v154_v49  ;;  %v167_v54 = vand.u32 2147483647, %v154_v49 }
 0x21b   : > { %v170_v56 = vor.u32 1.1754944e-38, %v169_v52  ;;  %vm168_vm6 = vcmp.eq.f32.partialorder %v167_v54, 8.507059e+37 }
 0x21f   : > { %v471_v50 = vpop.eup %470 }
 0x220   : > { %v159_v51 = vmul.f32 %v471_v50, %v154_v49  ;;  %vm164_vm2 = vweird.f32 %v471_v50 }
 0x221   : > { %vm165_vm4 = vmor %vm163_vm0, %vm164_vm2 }
 0x222   : > { %v160_v53 = vsub.f32 1.0, %v159_v51 }
 0x224   : > { %v161_v55 = vmul.f32 %v471_v50, %v160_v53 }
 0x226   : > { %v162_v57 = vadd.f32 %v471_v50, %v161_v55 }
 0x228   : > { %v166_v59 = vsel %vm165_vm4, %v471_v50, %v162_v57 }
 0x229   : > { %v171_v60 = vsel %vm168_vm6, %v170_v56, %v166_v59 }
 0x22a   : > { %v172_v61 = vmul.f32 %v171_v60, %v157_v58 }
 0x22c   : > { %173 = vst [vmem:[#allocation2 + $0x8] sm:$0xff] %v172_v61 }
 0x233   : > { %v263_v1 = vld [vmem:[#allocation2 + $0x8] ss:$0 sm:$0xff] }
 0x234   : > { %v264_v5 = vxor.u32 2147483648, %v263_v1 }
 0x236   : > { %v272_v9 = vmul.f32 %v264_v5, %v191_v0 }
 0x238   : > { %273 = vadd.xlane.f32.xlu1 %v272_v9 }
 0x287   : > { %v230_v45 = vpop.xlane.xlu2 %229 }
 0x288   : > { %v231_v47 = vsel %vm227_vm14, %v230_v45, %v221_v39 }
 0x289   : > { %v238_v48 = vmul.f32 %v234_v46, %v231_v47 }
 0x28b   : > { %239 = vadd.xlane.f32.xlu2 %v238_v48 }
 0x2ab   : > { %v274_v13 = vpop.xlane.xlu1 %273 }
 0x2ac   : > { %v275_v15 = vsel %vm267_vm9, %v274_v13, %v191_v0 }
 0x2ad   : > { %v308_v17 = vmul.f32 %v275_v15, %v171_v60 }
 0x2af   : > { %v310_v19 = vsel %vm163_vm0, %v275_v15, %v308_v17 }
 0x2b0   : > { %357 = vst [vmem:[%s323_s24 + $0x8] sm:$0xff] %v310_v19 }
 0x2fe   : > { %v240_v2 = vpop.xlane.xlu2 %239 }
 0x2ff   : > { %v241_v6 = vsel %vm237_vm8, %v240_v2, %v231_v47 }
 0x300   : > { %v248_v8 = vmul.f32 %v244_v4, %v241_v6 }
 0x302   : > { %249 = vadd.xlane.f32.xlu0 %v248_v8 }
 0x375   : > { %v250_v11 = vpop.xlane.xlu0 %249 }
 0x376   : > { %v251_v14 = vsel %vm247_vm1, %v250_v11, %v241_v6 }
 0x377   : > { %v258_v16 = vmul.f32 %v254_v12, %v251_v14 }
 0x379   : > { %259 = vadd.xlane.f32.xlu2 %v258_v16 }
 0x3ec   : > { %v260_v20 = vpop.xlane.xlu2 %259 }
 0x3ed   : > { %v261_v21 = vsel %vm257_vm10, %v260_v20, %v251_v14 }
 0x3ee   : > { %v268_v22 = vmul.f32 %v264_v5, %v261_v21 }
 0x3f0   : > { %269 = vadd.xlane.f32.xlu0 %v268_v22 }
 0x463   : > { %v270_v23 = vpop.xlane.xlu0 %269 }
 0x464   : > { %v271_v24 = vsel %vm267_vm9, %v270_v23, %v261_v21 }
 0x465   : > { %v290_v25 = vmul.f32 %v271_v24, %v554_v18 }
 0x467   : > { %v292_v26 = vsel %vm134_vm5, %v271_v24, %v290_v25 }
 0x468   : > { %355 = vst [vmem:[%s323_s24] sm:$0xff] %v292_v26 }
 0x469 PF: > { %s7_s8 = sadd.s32 1, %s494_s8   ;;  %s597_s6 = smov %s490_s7 }
 0x46a   : > { %p4_p5 = scmp.ge.s32.totalorder %s7_s8, 6   ;;  %s598_s7 = smov %s600_s10 }
 0x46c   :  { %6 = sbr.rel (!%p4_p5) target bundleno = 2 (0x2), region = 129 }

// kernel: custom-call.9
= control target key start
LH: loop header
LB: loop body
LE: loop exit
PB: predicated region body
PF: predicated region fallthrough
CT: control target
= control target key end

     0   :  { %s535_s6 = smov 0   ;;  %s537_s7 = smov 0   ;;  %s617_s0 = inlined_call_operand.vmem [shape: f32[4,1,9,9], index: 0, kind: input, shape index: {}]   ;;  %s618_s1 = inlined_call_operand.vmem [shape: f32[4,1,9,9], index: 1, kind: output, shape index: {}]  }
   0x1   :  { %s539_s8 = smov 0  }
   0x2 LB: > { %s451_s9 = sadd.s32 4294967295, %s521_s8   ;;  %s33_s10 = sadd.s32 1, %s517_s7  ;;  %s521_s8 = sphi %s539_s8, %s7_s8   ;;  %s517_s7 = sphi %s537_s7, %s620_s7   ;;  %s513_s6 = sphi %s535_s6, %s619_s6  }
   0x3   : > { %p35_p0 = scmp.ge.s32.totalorder %s33_s10, 4  ;;  %p453_p1 = scmp.ge.s32.totalorder %s521_s8, 4 }
   0x4   : > { %s49_s11 = sand.u32 (!%p453_p1), 1, %s521_s8   ;;  %s467_s12 = sshll.u32 (!%p453_p1), %s517_s7, 4 }
   0x5   : > { %s622_s10 = smov (%p35_p0, %s33_s10), 0  ;;  %47 = sbr.rel (%p453_p1) target bundleno = 13 (0xd), region = 16 }
   0x6   : > { %s454_s13 = sshll.u32 (!%p453_p1), %s49_s11, 4  ;;  %s58_s16 = scalar_lea.vmem (!%p453_p1), %s617_s0, %s467_s12 }
   0x7   : > { %s51_s17 = scalar_lea.vmem (!%p453_p1), [#allocation0], %s454_s13 }
   0xa   : > { %v89_v0 = vld [vmem:[%s58_s16] sm:$0xff]  ;;  %v91_v1 = vld [vmem:[%s58_s16 + $0x8] sm:$0xff] }
   0xb   : > { %90 = vst [vmem:[%s51_s17] sm:$0xff] %v89_v0 }
   0xc   : > { %92 = vst [vmem:[%s51_s17 + $0x8] sm:$0xff] %v91_v1 }
   0xd PF: > { %p457_p2 = scmp.ge.s32.totalorder %s521_s8, 1  ;;  %p97_p3 = scmp.lt.s32.totalorder %s521_s8, 5 }
   0xf   : > { %p98_p4 = pnand %p457_p2, %p97_p3 }
  0x11   : > { %101 = sbr.rel (%p98_p4) target bundleno = 1130 (0x46a), region = 54 }
  0x16   : > { %s104_s18 = sand.u32 1, %s451_s9   ;;  %v115_v2 = vlaneseq  ;;  %v523_v21 = vmov -1.0   ;;  %v524_v25 = vmov 0.0   ;;  %s468_s21 = sshll.u32 %s513_s6, 4 }
  0x17   : > { %s458_s19 = sshll.u32 %s104_s18, 4  ;;  %s350_s24 = scalar_lea.vmem %s618_s1, %s468_s21 }
  0x18   : > { %v562_v3 = vand.u32 127, %v115_v2  ;;  %v119_v4 = vshrl.u32 %v115_v2, 7  ;;  %s564_s20 = scalar_lea.vmem [#allocation0], %s458_s19 }
  0x19   : > { %v122_v5 = vld [vmem:[%s564_s20] sm:$0xff] }
  0x1a   : > { %vm121_vm0 = vcmp.eq.s32.totalorder %v119_v4, %v562_v3  ;;  %vm117_vm1 = vcmp.lt.s32.totalorder %v562_v3, 9  ;;  %vm126_vm2 = vcmp.le.s32.totalorder %v119_v4, %v562_v3  ;;  %v582_v20 = vadd.s32 8, %v119_v4 }
  0x1b   : > { %v123_v6 = vsel %vm121_vm0, %v122_v5, 0.0  ;;  %vm127_vm3 = vmand %vm126_vm2, %vm117_vm1  ;;  %vm189_vm8 = vcmp.eq.s32.totalorder %v562_v3, 8  ;;  %vm179_vm10 = vcmp.eq.s32.totalorder %v562_v3, %v119_v4  ;;  %vm197_vm11 = vcmp.eq.s32.totalorder %v562_v3, 7 }
  0x1c   : > { %124 = vadd.xlane.f32.xlu0 %v123_v6  ;;  %v128_v15 = vsel %vm127_vm3, %v122_v5, 0.0  ;;  %vm186_vm9 = vcmp.eq.s32.totalorder %v562_v3, %v582_v20  ;;  %v190_v22 = vsel %vm189_vm8, 1.0, %v523_v21  ;;  %v180_v26 = vsel %vm179_vm10, -1.0, %v524_v25 }
  0x1d   : > { %v191_v23 = vsel %vm186_vm9, %v190_v22, 0.0  ;;  %vm211_vm12 = vcmp.eq.s32.totalorder %v562_v3, 6  ;;  %vm225_vm13 = vcmp.eq.s32.totalorder %v562_v3, 5  ;;  %vm239_vm14 = vcmp.eq.s32.totalorder %v562_v3, 4 }
  0x1e   : > { %vm253_vm15 = vcmp.eq.s32.totalorder %v562_v3, 3  ;;  %vm150_vm0 = vcmp.eq.s32.totalorder %v582_v20, %v562_v3  ;;  %vm267_vm1 = vcmp.eq.s32.totalorder %v562_v3, 2  ;;  %vm281_vm2 = vcmp.eq.s32.totalorder %v562_v3, 1 }
  0x1f   : > { %vm294_vm8 = vcmp.eq.s32.totalorder %v562_v3, 0 }
  0x8f   : > { %v568_v7 = vpop.xlane.xlu0 %124 }
  0x90   : > { %495 = vrcp.f32 %v568_v7  ;;  %v140_v11 = vand.u32 2147483648, %v568_v7  ;;  %v138_v13 = vand.u32 2147483647, %v568_v7  ;;  %vm134_vm5 = vweird.f32 %v568_v7 }
  0x92   : > { %v141_v16 = vor.u32 1.1754944e-38, %v140_v11  ;;  %vm139_vm7 = vcmp.eq.f32.partialorder %v138_v13, 8.507059e+37 }
  0x96   : > { %v496_v8 = vpop.eup %495 }
  0x97   : > { %v130_v9 = vmul.f32 %v496_v8, %v568_v7  ;;  %vm135_vm4 = vweird.f32 %v496_v8 }
  0x98   : > { %vm136_vm6 = vmor %vm134_vm5, %vm135_vm4 }
  0x99   : > { %v131_v10 = vsub.f32 1.0, %v130_v9 }
  0x9b   : > { %v132_v12 = vmul.f32 %v496_v8, %v131_v10 }
  0x9d   : > { %v133_v14 = vadd.f32 %v496_v8, %v132_v12 }
  0x9f   : > { %v137_v17 = vsel %vm136_vm6, %v496_v8, %v133_v14  ;;  %v460_v8 = vld [vmem:[%s564_s20 + $0x8] sm:$0xff] }
  0xa0   : > { %v579_v18 = vsel %vm139_vm7, %v141_v16, %v137_v17  ;;  %v152_v9 = vsel %vm150_vm0, %v460_v8, 0.0 }
  0xa1   : > { %v143_v19 = vmul.f32 %v579_v18, %v128_v15 }
  0xa3   : > { %144 = vst [vmem:[#allocation2] sm:$0xff] %v143_v19 }
  0xaa   : > { %v193_v24 = vld [vmem:[#allocation2 + $0x7] ss:$0 sm:$0xff]  ;;  %v207_v30 = vld [vmem:[#allocation2 + $0x6] ss:$0 sm:$0xff]  ;;  %v221_v38 = vld [vmem:[#allocation2 + $0x5] ss:$0 sm:$0xff] }
  0xab   : > { %v194_v27 = vxor.u32 2147483648, %v193_v24  ;;  %v208_v33 = vxor.u32 2147483648, %v207_v30  ;;  %v222_v41 = vxor.u32 2147483648, %v221_v38  ;;  %v235_v46 = vld [vmem:[#allocation2 + $0x4] ss:$0 sm:$0xff] }
  0xac   : > { %v236_v49 = vxor.u32 2147483648, %v235_v46  ;;  %v249_v54 = vld [vmem:[#allocation2 + $0x3] ss:$0 sm:$0xff]  ;;  %v263_v62 = vld [vmem:[#allocation2 + $0x2] ss:$0 sm:$0xff] }
  0xad   : > { %v202_v28 = vmul.f32 %v194_v27, %v191_v23  ;;  %v198_v29 = vmul.f32 %v194_v27, %v180_v26  ;;  %v250_v57 = vxor.u32 2147483648, %v249_v54  ;;  %v264_v1 = vxor.u32 2147483648, %v263_v62  ;;  %v277_v10 = vld [vmem:[#allocation2 + $0x1] ss:$0 sm:$0xff]  ;;  %v290_v19 = vld [vmem:[#allocation2] ss:$0 sm:$0xff] }
  0xae   : > { %v278_v13 = vxor.u32 2147483648, %v277_v10  ;;  %v291_v22 = vxor.u32 2147483648, %v290_v19 }
  0xaf   : > { %203 = vadd.xlane.f32.xlu1 %v202_v28  ;;  %199 = vadd.xlane.f32.xlu0 %v198_v29 }
 0x122   : > { %v204_v31 = vpop.xlane.xlu1 %203  ;;  %v200_v32 = vpop.xlane.xlu0 %199 }
 0x123   : > { %v201_v34 = vsel %vm197_vm11, %v200_v32, %v180_v26  ;;  %v205_v35 = vsel %vm197_vm11, %v204_v31, %v191_v23 }
 0x124   : > { %v216_v36 = vmul.f32 %v208_v33, %v205_v35  ;;  %v212_v37 = vmul.f32 %v208_v33, %v201_v34 }
 0x126   : > { %217 = vadd.xlane.f32.xlu2 %v216_v36  ;;  %213 = vadd.xlane.f32.xlu1 %v212_v37 }
 0x199   : > { %v218_v39 = vpop.xlane.xlu2 %217  ;;  %v214_v40 = vpop.xlane.xlu1 %213 }
 0x19a   : > { %v219_v42 = vsel %vm211_vm12, %v218_v39, %v205_v35  ;;  %v215_v43 = vsel %vm211_vm12, %v214_v40, %v201_v34 }
 0x19b   : > { %v230_v44 = vmul.f32 %v222_v41, %v219_v42  ;;  %v226_v45 = vmul.f32 %v222_v41, %v215_v43 }
 0x19d   : > { %231 = vadd.xlane.f32.xlu0 %v230_v44  ;;  %227 = vadd.xlane.f32.xlu2 %v226_v45 }
 0x210   : > { %v228_v47 = vpop.xlane.xlu2 %227  ;;  %v232_v48 = vpop.xlane.xlu0 %231 }
 0x211   : > { %v229_v50 = vsel %vm225_vm13, %v228_v47, %v215_v43  ;;  %v233_v51 = vsel %vm225_vm13, %v232_v48, %v219_v42 }
 0x212   : > { %v240_v52 = vmul.f32 %v236_v49, %v229_v50  ;;  %v244_v53 = vmul.f32 %v236_v49, %v233_v51 }
 0x214   : > { %241 = vadd.xlane.f32.xlu1 %v240_v52  ;;  %245 = vadd.xlane.f32.xlu2 %v244_v53 }
 0x287   : > { %v242_v55 = vpop.xlane.xlu1 %241  ;;  %v246_v56 = vpop.xlane.xlu2 %245 }
 0x288   : > { %v243_v58 = vsel %vm239_vm14, %v242_v55, %v229_v50  ;;  %v247_v59 = vsel %vm239_vm14, %v246_v56, %v233_v51 }
 0x289   : > { %v254_v60 = vmul.f32 %v250_v57, %v243_v58  ;;  %v258_v61 = vmul.f32 %v250_v57, %v247_v59 }
 0x28b   : > { %255 = vadd.xlane.f32.xlu0 %v254_v60  ;;  %259 = vadd.xlane.f32.xlu1 %v258_v61 }
 0x2fe   : > { %v260_v63 = vpop.xlane.xlu1 %259  ;;  %v256_v0 = vpop.xlane.xlu0 %255 }
 0x2ff   : > { %v261_v2 = vsel %vm253_vm15, %v260_v63, %v247_v59  ;;  %v257_v4 = vsel %vm253_vm15, %v256_v0, %v243_v58 }
 0x300   : > { %v272_v5 = vmul.f32 %v264_v1, %v261_v2  ;;  %v268_v6 = vmul.f32 %v264_v1, %v257_v4 }
 0x302   : > { %273 = vadd.xlane.f32.xlu0 %v272_v5  ;;  %269 = vadd.xlane.f32.xlu2 %v268_v6 }
 0x30a   : > { %153 = vadd.xlane.f32.xlu0 %v152_v9 }
 0x375   : > { %v270_v11 = vpop.xlane.xlu2 %269  ;;  %v274_v12 = vpop.xlane.xlu0 %273 }
 0x376   : > { %v271_v14 = vsel %vm267_vm1, %v270_v11, %v257_v4  ;;  %v275_v15 = vsel %vm267_vm1, %v274_v12, %v261_v2 }
 0x377   : > { %v282_v16 = vmul.f32 %v278_v13, %v271_v14  ;;  %v286_v17 = vmul.f32 %v278_v13, %v275_v15 }
 0x379   : > { %283 = vadd.xlane.f32.xlu1 %v282_v16  ;;  %287 = vadd.xlane.f32.xlu2 %v286_v17 }
 0x37d   : > { %v154_v27 = vpop.xlane.xlu0 %153 }
 0x37e   : > { %497 = vrcp.f32 %v154_v27  ;;  %v169_v32 = vand.u32 2147483648, %v154_v27  ;;  %vm163_vm3 = vweird.f32 %v154_v27  ;;  %v167_v34 = vand.u32 2147483647, %v154_v27 }
 0x380   : > { %v170_v35 = vor.u32 1.1754944e-38, %v169_v32  ;;  %vm168_vm7 = vcmp.eq.f32.partialorder %v167_v34, 8.507059e+37 }
 0x384   : > { %v498_v28 = vpop.eup %497 }
 0x385   : > { %v159_v29 = vmul.f32 %v498_v28, %v154_v27  ;;  %vm164_vm4 = vweird.f32 %v498_v28 }
 0x386   : > { %vm165_vm6 = vmor %vm163_vm3, %vm164_vm4 }
 0x387   : > { %v160_v30 = vsub.f32 1.0, %v159_v29 }
 0x389   : > { %v161_v31 = vmul.f32 %v498_v28, %v160_v30 }
 0x38b   : > { %v162_v33 = vadd.f32 %v498_v28, %v161_v31 }
 0x38d   : > { %v166_v36 = vsel %vm165_vm6, %v498_v28, %v162_v33 }
 0x38e   : > { %v171_v37 = vsel %vm168_vm7, %v170_v35, %v166_v36 }
 0x3ec   : > { %v284_v21 = vpop.xlane.xlu1 %283  ;;  %v288_v20 = vpop.xlane.xlu2 %287 }
 0x3ed   : > { %v285_v23 = vsel %vm281_vm2, %v284_v21, %v271_v14  ;;  %v289_v24 = vsel %vm281_vm2, %v288_v20, %v275_v15 }
 0x3ee   : > { %v295_v25 = vmul.f32 %v291_v22, %v285_v23  ;;  %v299_v26 = vmul.f32 %v291_v22, %v289_v24 }
 0x3f0   : > { %296 = vadd.xlane.f32.xlu1 %v295_v25  ;;  %300 = vadd.xlane.f32.xlu2 %v299_v26 }
 0x463   : > { %v297_v38 = vpop.xlane.xlu1 %296  ;;  %v301_v39 = vpop.xlane.xlu2 %300 }
 0x464   : > { %v298_v40 = vsel %vm294_vm8, %v297_v38, %v285_v23  ;;  %v302_v41 = vsel %vm294_vm8, %v301_v39, %v289_v24 }
 0x465   : > { %v317_v42 = vmul.f32 %v298_v40, %v579_v18  ;;  %v335_v43 = vmul.f32 %v302_v41, %v171_v37 }
 0x467   : > { %v319_v44 = vsel %vm134_vm5, %v298_v40, %v317_v42  ;;  %v337_v45 = vsel %vm163_vm3, %v302_v41, %v335_v43 }
 0x468   : > { %382 = vst [vmem:[%s350_s24] sm:$0xff] %v319_v44 }
 0x469   : > { %384 = vst [vmem:[%s350_s24 + $0x8] sm:$0xff] %v337_v45 }
 0x46a PF: > { %s7_s8 = sadd.s32 1, %s521_s8   ;;  %s619_s6 = smov %s517_s7 }
 0x46b   : > { %p4_p5 = scmp.ge.s32.totalorder %s7_s8, 6   ;;  %s620_s7 = smov %s622_s10 }
 0x46d   :  { %6 = sbr.rel (!%p4_p5) target bundleno = 2 (0x2), region = 128 }

// kernel: sub.8
= control target key start
LH: loop header
LB: loop body
LE: loop exit
PB: predicated region body
PF: predicated region fallthrough
CT: control target
= control target key end

     0   :  { %s56_s0 = inlined_call_operand.vmem [shape: f32[2,2,1,32], index: 0, kind: input, shape index: {}]   ;;  %s57_s1 = inlined_call_operand.vmem [shape: f32[2,2,1,32], index: 1, kind: input, shape index: {}]   ;;  %s58_s2 = inlined_call_operand.vmem [shape: f32[2,2,1,32], index: 2, kind: output, shape index: {}]  }
   0x1   :  { %v3_v0 = vld [vmem:[%s56_s0] sm:$0x3]  ;;  %v20_v2 = vld [vmem:[%s56_s0 + $0x2] sm:$0x3] }
   0x2   :  { %v4_v1 = vld [vmem:[%s57_s1] sm:$0x3]  ;;  %v21_v4 = vld [vmem:[%s57_s1 + $0x2] sm:$0x3] }
   0x3   :  { %v7_v3 = vsub.f32 %v3_v0, %v4_v1  ;;  %v16_v5 = vsub.f32 %v20_v2, %v21_v4 }
   0x5   :  { %9 = vst [vmem:[%s58_s2] sm:$0x3] %v7_v3 }
   0x6   :  { %22 = vst [vmem:[%s58_s2 + $0x2] sm:$0x3] %v16_v5 }

// kernel: _lambda_.3
= control target key start
LH: loop header
LB: loop body
LE: loop exit
PB: predicated region body
PF: predicated region fallthrough
CT: control target
= control target key end

     0   :  { %s808_s12 = smov 0   ;;  %s810_s13 = smov 0   ;;  %s983_s0 = inlined_call_operand.vmem [shape: f32[2,8,128], index: 0, kind: input, shape index: {}]   ;;  %s984_s1 = inlined_call_operand.vmem [shape: f32[96,8], index: 1, kind: input, shape index: {}]   ;;  %s985_s2 = inlined_call_operand.vmem [shape: f32[2,2,16,32], index: 2, kind: input, shape index: {}]   ;;  %s986_s3 = inlined_call_operand.vmem [shape: f32[2,8,128], index: 3, kind: output, shape index: {}]  }
   0x1   :  { %s812_s14 = smov 0   ;;  %s814_s15 = smov 0  }
   0x2   :  { %s816_s16 = smov 0  }
   0x3 LB: > { %s25_s17 = sadd.s32 1, %s776_s14  ;;  %s32_s18 = sadd.s32 1, %s780_s15  ;;  %s784_s16 = sphi %s816_s16, %s13_s16   ;;  %s780_s15 = sphi %s814_s15, %s996_s15   ;;  %s776_s14 = sphi %s812_s14, %s995_s14   ;;  %s772_s13 = sphi %s810_s13, %s994_s13   ;;  %s768_s12 = sphi %s808_s12, %s993_s12  }
   0x4   : > { %p26_p0 = scmp.ge.s32.totalorder %s25_s17, 2  ;;  %p669_p1 = scmp.ge.s32.totalorder %s784_s16, 1 }
   0x5   : > { %p178_p2 = scmp.lt.s32.totalorder %s784_s16, 5 }
   0x6   : > { %s998_s17 = smov (%p26_p0, %s25_s17), 0  ;;  %s1000_s18 = smov (!%p26_p0, %s32_s18), %s780_s15 }
   0x7   : > { %p179_p3 = pnand %p669_p1, %p178_p2  ;;  %p34_p4 = scmp.ge.s32.totalorder %s1000_s18, 2 }
   0x8   : > { %p215_p5 = scmp.lt.s32.totalorder (!%p179_p3), %s772_s13, 1  ;;  %p222_p6 = scmp.lt.s32.totalorder (!%p179_p3), %s768_s12, 1 }
   0x9   : > { %s1002_s18 = smov (%p34_p4, %s1000_s18), 0  ;;  %182 = sbr.rel (%p179_p3) target bundleno = 367 (0x16f), region = 32 }
   0xa   : > { %p675_p7 = scmp.ne.s32.totalorder (!%p179_p3), %s768_s12, 0 }
   0xe   : > { %s1004_s13 = smov (!%p215_p5, %s772_s13), 1 }
   0xf   : > { %s223_s19 = scalar_select %p222_p6, %s768_s12, 1 }
  0x10   : > { %s670_s20 = sshll.u32 %s1004_s13, 3  ;;  %s671_s21 = sshll.u32 %s1004_s13, 1 }
  0x11   : > { %s221_s24 = scalar_lea.vmem %s983_s0, %s670_s20  ;;  %s672_s25 = sshll.u32 %s223_s19, 2 }
  0x12   : > { %s228_s26 = sadd.s32 %s672_s25, %s671_s21  ;;  %s844_s29 = scalar_lea.vmem %s986_s3, %s670_s20 }
  0x13   : > { %s673_s30 = sshll.u32 %s228_s26, 3  ;;  %241 = sbr.rel (%p675_p7) target bundleno = 26 (0x1a), region = 36 }
  0x14   : > { %s849_s6 = scalar_lea.vmem %s985_s2, %s673_s30 }
  0x18   : > { %v242_v0 = vld [vmem:[%s221_s24] sm:$0xff] }
  0x19   : > { %243 = vst [vmem:[%s844_s29] sm:$0xff] %v242_v0 }
  0x1a PF: > { %v249_v2 = vld [vmem:[%s984_s1 + $0x20] sm:$0xff]  ;;  %vm257_vm0 = vcmask 64512   ;;  %v250_v5 = vld [vmem:[%s984_s1 + $0x28] sm:$0xff]  ;;  %v251_v8 = vld [vmem:[%s984_s1 + $0x30] sm:$0xff]  ;;  %v367_v20 = vlaneseq  ;;  %v786_v51 = vmov 0.0   ;;  %v787_v53 = vmov 1.0  }
  0x1b   : > { %v253_v3 = vld [vmem:[%s984_s1 + $0x40] sm:$0xff]  ;;  %v254_v6 = vld [vmem:[%s984_s1 + $0x48] sm:$0xff]  ;;  %v255_v9 = vld [vmem:[%s984_s1 + $0x50] sm:$0xff] }
  0x1c   : > { %v245_v4 = vld [vmem:[%s984_s1] sm:$0xff]  ;;  %v246_v7 = vld [vmem:[%s984_s1 + $0x8] sm:$0xff]  ;;  %v247_v10 = vld [vmem:[%s984_s1 + $0x10] sm:$0xff]  ;;  %v368_v22 = vshrl.u32 %v367_v20, 7 }
  0x1d   : > { %v252_v11 = vld [vmem:[%s984_s1 + $0x38] sm:$0xff] }
  0x1e   : > { %v256_v12 = vld [vmem:[%s984_s1 + $0x58] sm:$0xff]  ;;  %v369_v25 = vadd.s32 8, %v368_v22  ;;  %v370_v26 = vadd.s32 16, %v368_v22  ;;  %v371_v28 = vadd.s32 24, %v368_v22  ;;  %v372_v30 = vcvt.s32.f32 %v368_v22 }
  0x1f   : > { %v248_v13 = vld [vmem:[%s984_s1 + $0x18] sm:$0xff] }
  0x20   : > { %v853_v1 = vld [vmem:[%s844_s29] sm:$0xff]  ;;  %v373_v29 = vcvt.s32.f32 %v369_v25  ;;  %v374_v31 = vcvt.s32.f32 %v370_v26  ;;  %v375_v34 = vcvt.s32.f32 %v371_v28 }
  0x21   : > { %700 = vmatpush.msra.mxu2 %v853_v1  ;;  %701 = vmatpush.msra.mxu3 %v853_v1 }
  0x22   : > { %680 = vmatmul.msk.f32.vlgmr.msra.gmra.mxu2 %vm257_vm0, %v249_v2  ;;  %684 = vmatmul.msk.f32.vlgmr.msra.gmra.mxu3 %vm257_vm0, %v253_v3 }
  0x23   : > { %309 = vmatpush.msra.mxu0 %v853_v1 }
  0x24   : > { %676 = vmatmul.msk.f32.vlgmr.msra.gmra.mxu0 %vm257_vm0, %v245_v4 }
  0x2a   : > { %681 = vmatmul.msk.f32.gmra.mxu2 %vm257_vm0, %v250_v5  ;;  %685 = vmatmul.msk.f32.gmra.mxu3 %vm257_vm0, %v254_v6  ;;  %v402_v6 = vld [vmem:[%s849_s6] sm:$0xff] }
  0x2c   : > { %677 = vmatmul.msk.f32.gmra.mxu0 %vm257_vm0, %v246_v7 }
  0x32   : > { %682 = vmatmul.msk.f32.gmra.mxu2 %vm257_vm0, %v251_v8  ;;  %686 = vmatmul.msk.f32.gmra.mxu3 %vm257_vm0, %v255_v9 }
  0x34   : > { %678 = vmatmul.msk.f32.gmra.mxu0 %vm257_vm0, %v247_v10 }
  0x3a   : > { %683 = vmatmul.msk.f32.gmra.mxu2 %vm257_vm0, %v252_v11  ;;  %687 = vmatmul.msk.f32.gmra.mxu3 %vm257_vm0, %v256_v12 }
  0x3c   : > { %679 = vmatmul.msk.f32.gmra.mxu0 %vm257_vm0, %v248_v13 }
  0xa1   : > { %v906_v14 = vpop.f32.mrf.mxu0 }
  0xa2   : > { %vm347_vm3 = vcmp.ge.f32.partialorder %v906_v14, -1e-06 }
  0xa5   : > { %v908_v15 = vpop.f32.mrf.mxu2  ;;  %v910_v16 = vpop.f32.mrf.mxu3 }
  0xa6   : > { %vm351_vm4 = vcmp.ge.f32.partialorder %v908_v15, -1e-06  ;;  %vm359_vm10 = vcmp.ge.f32.partialorder %v910_v16, -1e-06 }
  0xa7   : > { %vm355_vm9 = vmand %vm347_vm3, %vm351_vm4 }
  0xa8   : > { %vm363_vm15 = vmand %vm355_vm9, %vm359_vm10  ;;  %vm404_vm9 = vcmask 261120  }
  0xa9   : > { %v912_v17 = vpop.f32.mrf.mxu0  ;;  %v376_v36 = vsel %vm363_vm15, %v372_v30, 1e+09  ;;  %vm553_vm15 = vcmask 1042432  }
  0xaa   : > { %vm348_vm1 = vcmp.ge.f32.partialorder %v912_v17, -1e-06 }
  0xad   : > { %v914_v18 = vpop.f32.mrf.mxu2  ;;  %v916_v19 = vpop.f32.mrf.mxu3 }
  0xae   : > { %vm352_vm2 = vcmp.ge.f32.partialorder %v914_v18, -1e-06  ;;  %vm360_vm8 = vcmp.ge.f32.partialorder %v916_v19, -1e-06 }
  0xaf   : > { %vm356_vm7 = vmand %vm348_vm1, %vm352_vm2 }
  0xb0   : > { %vm364_vm13 = vmand %vm356_vm7, %vm360_vm8 }
  0xb1   : > { %v918_v21 = vpop.f32.mrf.mxu0  ;;  %v377_v35 = vsel %vm364_vm13, %v373_v29, 1e+09 }
  0xb2   : > { %vm349_vm5 = vcmp.ge.f32.partialorder %v918_v21, -1e-06  ;;  %v380_v39 = vmin.f32 %v376_v36, %v377_v35 }
  0xb5   : > { %v329_v23 = vpop.f32.mrf.mxu2  ;;  %v341_v24 = vpop.f32.mrf.mxu3 }
  0xb6   : > { %vm353_vm6 = vcmp.ge.f32.partialorder %v329_v23, -1e-06  ;;  %vm361_vm12 = vcmp.ge.f32.partialorder %v341_v24, -1e-06 }
  0xb7   : > { %vm357_vm11 = vmand %vm349_vm5, %vm353_vm6 }
  0xb8   : > { %vm365_vm0 = vmand %vm357_vm11, %vm361_vm12 }
  0xb9   : > { %v320_v27 = vpop.f32.mrf.mxu0  ;;  %v378_v37 = vsel %vm365_vm0, %v374_v31, 1e+09  ;;  %vm555_vm0 = vcmask 1043456  }
  0xba   : > { %vm350_vm14 = vcmp.ge.f32.partialorder %v320_v27, -1e-06 }
  0xbd   : > { %v332_v32 = vpop.f32.mrf.mxu2  ;;  %v344_v33 = vpop.f32.mrf.mxu3 }
  0xbe   : > { %vm354_vm1 = vcmp.ge.f32.partialorder %v332_v32, -1e-06  ;;  %vm362_vm2 = vcmp.ge.f32.partialorder %v344_v33, -1e-06 }
  0xbf   : > { %vm358_vm3 = vmand %vm350_vm14, %vm354_vm1  ;;  %vm551_vm14 = vcmask 1041408   ;;  %vm557_vm1 = vcmask 1044480  }
  0xc0   : > { %vm366_vm4 = vmand %vm358_vm3, %vm362_vm2  ;;  %vm559_vm2 = vcmask 1045504   ;;  %vm561_vm3 = vcmask 1046528  }
  0xc1   : > { %v379_v38 = vsel %vm366_vm4, %v375_v34, 1e+09 }
  0xc2   : > { %v381_v40 = vmin.f32 %v378_v37, %v379_v38 }
  0xc4   : > { %v382_v41 = vmin.f32 %v380_v39, %v381_v40 }
  0xc6   : > { %v383_v42 = vrot.slane %v382_v41, 4 }
  0xc8   : > { %v384_v43 = vmin.f32 %v382_v41, %v383_v42 }
  0xca   : > { %v385_v44 = vrot.slane %v384_v43, 2 }
  0xcc   : > { %v386_v45 = vmin.f32 %v384_v43, %v385_v44 }
  0xce   : > { %v387_v46 = vrot.slane %v386_v45, 1 }
  0xd0   : > { %v388_v47 = vmin.f32 %v386_v45, %v387_v46  ;;  %v517_v45 = vrot.slane %v853_v1, 6  ;;  %v510_v46 = vrot.slane %v853_v1, 5 }
  0xd2   : > { %v389_v48 = vmin.f32 %v388_v47, 31.0 }
  0xd4   : > { %vm393_vm5 = vcmp.eq.f32.partialorder %v375_v34, %v389_v48  ;;  %vm392_vm6 = vcmp.eq.f32.partialorder %v374_v31, %v389_v48  ;;  %vm927_vm7 = vcmp.eq.f32.partialorder %v373_v29, %v389_v48  ;;  %vm931_vm8 = vcmp.eq.f32.partialorder %v372_v30, %v389_v48 }
  0xd5   : > { %v691_v52 = vsel %vm393_vm5, 1.0, %v786_v51  ;;  %692 = vmatpush.msk.msra.mxu1 %vm393_vm5, %v787_v53  ;;  %v690_v54 = vsel %vm392_vm6, 1.0, %v786_v51  ;;  %v689_v55 = vsel %vm927_vm7, 1.0, %v786_v51  ;;  %v688_v56 = vsel %vm931_vm8, 1.0, %v786_v51 }
  0xd6   : > { %v437_v57 = vmul.f32 %v691_v52, %v332_v32  ;;  %v451_v58 = vmul.f32 %v691_v52, %v344_v33  ;;  %v465_v59 = vmul.f32 %v691_v52, %v320_v27  ;;  %v436_v60 = vmul.f32 %v690_v54, %v329_v23 }
  0xd7   : > { %693 = vmatpush.msk.msra.mxu1 %vm392_vm6, %v787_v53  ;;  %v450_v61 = vmul.f32 %v690_v54, %v341_v24  ;;  %v464_v62 = vmul.f32 %v690_v54, %v918_v21  ;;  %v435_v63 = vmul.f32 %v689_v55, %v914_v18  ;;  %v449_v0 = vmul.f32 %v689_v55, %v916_v19  ;;  %v403_v19 = vld [vmem:[%s849_s6 + $0x8] sm:$0xff] }
  0xd8   : > { %v463_v2 = vmul.f32 %v689_v55, %v912_v17  ;;  %v434_v3 = vmul.f32 %v688_v56, %v908_v15  ;;  %v448_v4 = vmul.f32 %v688_v56, %v910_v16  ;;  %v462_v5 = vmul.f32 %v688_v56, %v906_v14 }
  0xd9   : > { %694 = vmatpush.msk.msra.mxu1 %vm927_vm7, %v787_v53  ;;  %v507_v51 = vrot.slane %v853_v1, 4 }
  0xda   : > { %v438_v7 = vadd.f32 %v435_v63, %v434_v3  ;;  %v452_v8 = vadd.f32 %v449_v0, %v448_v4  ;;  %v466_v9 = vadd.f32 %v463_v2, %v462_v5  ;;  %v527_v0 = vrot.slane %v853_v1, 3 }
  0xdb   : > { %695 = vmatpush.msk.msra.mxu1 %vm931_vm8, %v787_v53 }
  0xdc   : > { %v439_v10 = vadd.f32 %v438_v7, %v436_v60  ;;  %v453_v11 = vadd.f32 %v452_v8, %v450_v61  ;;  %v467_v12 = vadd.f32 %v466_v9, %v464_v62  ;;  %696 = vmatmul.msk.f32.vlgmr.msra.gmra.mxu1 %vm404_vm9, %v402_v6  ;;  %v524_v6 = vrot.slane %v853_v1, 2 }
  0xde   : > { %v440_v13 = vadd.f32 %v439_v10, %v437_v57  ;;  %v454_v15 = vadd.f32 %v453_v11, %v451_v58  ;;  %v468_v14 = vadd.f32 %v467_v12, %v465_v59 }
  0xe0   : > { %v441_v16 = vrot.slane %v440_v13, 4  ;;  %v455_v17 = vrot.slane %v454_v15, 4  ;;  %v469_v18 = vrot.slane %v468_v14, 4 }
  0xe2   : > { %v442_v20 = vadd.f32 %v441_v16, %v440_v13  ;;  %v456_v21 = vadd.f32 %v455_v17, %v454_v15  ;;  %v470_v22 = vadd.f32 %v469_v18, %v468_v14 }
  0xe4   : > { %v443_v23 = vrot.slane %v442_v20, 2  ;;  %v457_v24 = vrot.slane %v456_v21, 2  ;;  %v471_v25 = vrot.slane %v470_v22, 2  ;;  %697 = vmatmul.msk.f32.gmra.mxu1 %vm404_vm9, %v403_v19 }
  0xe6   : > { %v444_v26 = vadd.f32 %v443_v23, %v442_v20  ;;  %v458_v27 = vadd.f32 %v457_v24, %v456_v21  ;;  %v472_v28 = vadd.f32 %v471_v25, %v470_v22 }
  0xe8   : > { %v445_v29 = vrot.slane %v444_v26, 1  ;;  %v459_v30 = vrot.slane %v458_v27, 1  ;;  %v473_v31 = vrot.slane %v472_v28, 1 }
  0xea   : > { %v446_v32 = vadd.f32 %v445_v29, %v444_v26  ;;  %v460_v33 = vadd.f32 %v459_v30, %v458_v27  ;;  %v474_v34 = vadd.f32 %v473_v31, %v472_v28 }
  0xec   : > { %v447_v35 = vand.u32 2147483647, %v446_v32  ;;  %v461_v36 = vand.u32 2147483647, %v460_v33  ;;  %v475_v37 = vand.u32 2147483647, %v474_v34 }
  0xee   : > { %v476_v38 = vadd.f32 %v461_v36, %v447_v35 }
  0xf0   : > { %v477_v39 = vadd.f32 %v476_v38, %v475_v37 }
  0xf2   : > { %v478_v40 = vmax.f32 %v477_v39, 1e-12 }
  0xf4   : > { %744 = vrcp.f32 %v478_v40  ;;  %vm484_vm11 = vweird.f32 %v478_v40  ;;  %v490_v52 = vand.u32 2147483648, %v478_v40  ;;  %v488_v56 = vand.u32 2147483647, %v478_v40 }
  0xf6   : > { %v491_v2 = vor.u32 1.1754944e-38, %v490_v52  ;;  %vm489_vm13 = vcmp.eq.f32.partialorder %v488_v56, 8.507059e+37 }
  0xfa   : > { %v745_v41 = vpop.eup %744 }
  0xfb   : > { %v480_v42 = vmul.f32 %v745_v41, %v478_v40  ;;  %vm485_vm10 = vweird.f32 %v745_v41 }
  0xfc   : > { %vm957_vm12 = vmor %vm484_vm11, %vm485_vm10 }
  0xfd   : > { %v481_v43 = vsub.f32 1.0, %v480_v42 }
  0xff   : > { %v482_v44 = vmul.f32 %v745_v41, %v481_v43 }
 0x101   : > { %v483_v48 = vadd.f32 %v745_v41, %v482_v44 }
 0x103   : > { %v487_v59 = vsel %vm957_vm12, %v745_v41, %v483_v48 }
 0x104   : > { %v492_v7 = vsel %vm489_vm13, %v491_v2, %v487_v59 }
 0x159   : > { %v428_v47 = vpop.f32.mrf.mxu1 }
 0x15a   : > { %v495_v49 = vmul.f32 %v461_v36, %v428_v47  ;;  %v500_v50 = vmul.f32 %v475_v37, %v428_v47  ;;  %v519_v53 = vmul.f32 %v517_v45, %v428_v47  ;;  %v512_v54 = vmul.f32 %v510_v46, %v428_v47 }
 0x15b   : > { %v494_v57 = vmul.f32 %v447_v35, %v428_v47  ;;  %v509_v63 = vmul.f32 %v507_v51, %v428_v47 }
 0x15c   : > { %v497_v58 = vrot.slane %v495_v49, 2  ;;  %v514_v60 = vrot.slane %v512_v54, 1  ;;  %v502_v62 = vrot.slane %v500_v50, 4  ;;  %v521_v3 = vrot.slane %v519_v53, 1 }
 0x15e   : > { %v499_v61 = vadd.f32 %v497_v58, %v494_v57  ;;  %v516_v5 = vadd.f32 %v514_v60, %v509_v63  ;;  %v523_v12 = vadd.f32 %v521_v3, %v512_v54 }
 0x160   : > { %v504_v4 = vadd.f32 %v502_v62, %v499_v61  ;;  %v540_v16 = vrot.slane %v516_v5, 4  ;;  %v543_v20 = vrot.slane %v523_v12, 3 }
 0x161   : > { %v431_v8 = vpop.f32.mrf.mxu1 }
 0x162   : > { %v505_v9 = vmul.f32 %v504_v4, %v492_v7  ;;  %v529_v10 = vmul.f32 %v527_v0, %v431_v8  ;;  %v534_v11 = vmul.f32 %v507_v51, %v431_v8  ;;  %v526_v13 = vmul.f32 %v524_v6, %v431_v8 }
 0x164   : > { %v531_v15 = vrot.slane %v529_v10, 1  ;;  %v536_v14 = vrot.slane %v534_v11, 1  ;;  %v552_v19 = vsel %vm551_vm14, %v505_v9, %v540_v16 }
 0x165   : > { %v554_v23 = vsel %vm553_vm15, %v552_v19, %v543_v20 }
 0x166   : > { %v533_v17 = vadd.f32 %v531_v15, %v526_v13  ;;  %v538_v18 = vadd.f32 %v536_v14, %v529_v10 }
 0x168   : > { %v546_v21 = vrot.slane %v533_v17, 4  ;;  %v549_v22 = vrot.slane %v538_v18, 3 }
 0x16a   : > { %v556_v24 = vsel %vm555_vm0, %v554_v23, %v546_v21 }
 0x16b   : > { %v558_v25 = vsel %vm557_vm1, %v556_v24, %v549_v22 }
 0x16c   : > { %v560_v26 = vsel %vm559_vm2, %v558_v25, %v853_v1 }
 0x16d   : > { %v562_v27 = vsel %vm561_vm3, %v560_v26, %v853_v1 }
 0x16e   : > { %563 = vst [vmem:[%s844_s29] sm:$0xff] %v562_v27 }
 0x16f PF: > { %s13_s16 = sadd.s32 1, %s784_s16   ;;  %s993_s12 = smov %s776_s14 }
 0x170   : > { %p10_p8 = scmp.ge.s32.totalorder %s13_s16, 6   ;;  %s994_s13 = smov %s780_s15 }
 0x171   : > { %s995_s14 = smov %s998_s17  ;;  %s996_s15 = smov %s1002_s18 }
 0x172   :  { %12 = sbr.rel (!%p10_p8) target bundleno = 3 (0x3), region = 69 }

</bundles_post_ra>
